<compile_context>
chip_gen: v7x
topology: tpu7x:2x2x1
jax: 0.10.0
libtpu: 0.0.40
codegen_flags: <defaults>
</compile_context>

<pallas_src>
import functools

import jax
import jax.numpy as jnp
from jax.experimental import pallas as pl
from jax.experimental.pallas import tpu as pltpu


def _round_up(n, m):
    return (n + m - 1) // m * m


def _lstm_fc_kernel(x_ref, wih_ref, whh_ref, b_ref, wfc_ref, bfc_ref, out_ref,
                    *, seq_len, batch_pad, hidden_pad):
    """Whole forward pass in one invocation.

    x_ref   : (T*Bp, F)     time-major, batch-padded input
    wih_ref : (F, 4*Hp)     input->gates weight (transposed, gate-lane padded)
    whh_ref : (Hp, 4*Hp)    hidden->gates weight (transposed, row+lane padded)
    b_ref   : (1, 4*Hp)     combined bias (b_ih + b_hh), gate-lane padded
    wfc_ref : (Hp, Cp)      FC weight (transposed, zero-padded)
    bfc_ref : (1, Cp)       FC bias (zero-padded)
    out_ref : (Bp, Cp)      lane-dense logits slab
    Gate order is PyTorch's (i, f, g, o); each gate owns one 128-lane block.
    """
    T, Bp, Hp = seq_len, batch_pad, hidden_pad

    # Phase 1: hoisted input projection -- one matmul for ALL time steps.
    pre = (jnp.dot(x_ref[...], wih_ref[...], preferred_element_type=jnp.float32)
           + b_ref[...])                                   # (T*Bp, 4*Hp)

    whh = whh_ref[...]                                     # hoisted load
    h = jnp.zeros((Bp, Hp), jnp.float32)
    c = jnp.zeros((Bp, Hp), jnp.float32)

    # Phase 2: recurrence, fully unrolled.  Row slices start at multiples of
    # 8 (sublane tile) and gate slices at multiples of 128 (lane tile), so
    # no relayout is needed on the serial critical path.
    for t in range(T):
        gates = pre[t * Bp:(t + 1) * Bp, :] + jnp.dot(
            h, whh, preferred_element_type=jnp.float32)    # (Bp, 4*Hp)
        i_g = jax.nn.sigmoid(gates[:, 0 * Hp:1 * Hp])
        f_g = jax.nn.sigmoid(gates[:, 1 * Hp:2 * Hp])
        g_g = jnp.tanh(gates[:, 2 * Hp:3 * Hp])
        o_g = jax.nn.sigmoid(gates[:, 3 * Hp:4 * Hp])
        c = f_g * c + i_g * g_g
        h = o_g * jnp.tanh(c)

    # Phase 3: classification head on the last hidden state (lane-dense out).
    out_ref[...] = (jnp.dot(h, wfc_ref[...], preferred_element_type=jnp.float32)
                    + bfc_ref[...]).astype(out_ref.dtype)


def action_recognition_lstm(x, params):
    """x: (B, T, F) float32, batch_first like PyTorch. Returns (B, C) logits."""
    B, T, F = x.shape
    w_ih = params["w_ih"]       # (4H, F)
    w_hh = params["w_hh"]       # (4H, H)
    b_ih = params["b_ih"]       # (4H,)
    b_hh = params["b_hh"]       # (4H,)
    w_fc = params["w_fc"]       # (C, H)
    b_fc = params["b_fc"]       # (C,)
    H = w_hh.shape[1]
    C = w_fc.shape[0]

    Bp = _round_up(B, 8)        # full sublanes per vreg
    Hp = _round_up(H, 128)      # each gate gets its own 128-lane block
    Cp = _round_up(C, 128)      # lane-dense output store

    f32 = jnp.float32

    def pad_gate_cols(w):       # (rows, 4H) -> (rows, 4*Hp); zeros in pad lanes
        r = w.shape[0]
        w4 = w.reshape(r, 4, H)
        return jnp.pad(w4, ((0, 0), (0, 0), (0, Hp - H))).reshape(r, 4 * Hp)

    wih_t = pad_gate_cols(jnp.transpose(w_ih).astype(f32))                  # (F, 4Hp)
    whh_t = jnp.pad(pad_gate_cols(jnp.transpose(w_hh).astype(f32)),
                    ((0, Hp - H), (0, 0)))                                  # (Hp, 4Hp)
    bias = pad_gate_cols((b_ih + b_hh).astype(f32).reshape(1, 4 * H))       # (1, 4Hp)
    wfc_t = jnp.pad(jnp.transpose(w_fc).astype(f32),
                    ((0, Hp - H), (0, Cp - C)))                             # (Hp, Cp)
    bfc = jnp.pad(b_fc.astype(f32).reshape(1, C), ((0, 0), (0, Cp - C)))    # (1, Cp)

    # Time-major, batch padded to Bp, flattened: the hoisted input projection
    # becomes one plain 2-D matmul and each step's rows are a contiguous
    # sublane-tile block.  (This transpose is a tiny one-off XLA op.)
    x_tm = jnp.pad(jnp.transpose(x, (1, 0, 2)).astype(f32),
                   ((0, 0), (0, Bp - B), (0, 0))).reshape(T * Bp, F)

    kernel = functools.partial(_lstm_fc_kernel, seq_len=T, batch_pad=Bp,
                               hidden_pad=Hp)

    vmem = pl.BlockSpec(memory_space=pltpu.MemorySpace.VMEM)
    out = pl.pallas_call(
        kernel,
        out_shape=jax.ShapeDtypeStruct((Bp, Cp), jnp.float32),
        in_specs=[vmem] * 6,
        out_specs=vmem,
    )(x_tm, wih_t, whh_t, bias, wfc_t, bfc)

    return out[:B, :C]


def _reference(x, params):
    """Pure-JAX reference matching torch.nn.LSTM + Linear semantics."""
    w_ih, w_hh = params["w_ih"], params["w_hh"]
    b = params["b_ih"] + params["b_hh"]
    w_fc, b_fc = params["w_fc"], params["b_fc"]
    B, T, F = x.shape
    H = w_hh.shape[1]

    def step(carry, x_t):
        h, c = carry
        gates = x_t @ w_ih.T + h @ w_hh.T + b
        i = jax.nn.sigmoid(gates[:, 0 * H:1 * H])
        f = jax.nn.sigmoid(gates[:, 1 * H:2 * H])
        g = jnp.tanh(gates[:, 2 * H:3 * H])
        o = jax.nn.sigmoid(gates[:, 3 * H:4 * H])
        c = f * c + i * g
        h = o * jnp.tanh(c)
        return (h, c), None

    h0 = jnp.zeros((B, H), jnp.float32)
    c0 = jnp.zeros((B, H), jnp.float32)
    (h_last, _), _ = jax.lax.scan(step, (h0, c0), jnp.transpose(x, (1, 0, 2)))
    return h_last @ w_fc.T + b_fc


def _init_params(key, input_size, hidden_size, num_classes):
    """Deterministic uniform(-1/sqrt(H), 1/sqrt(H)) init, like PyTorch."""
    ks = jax.random.split(key, 6)
    bound = 1.0 / jnp.sqrt(jnp.float32(hidden_size))
    u = lambda k, shape: jax.random.uniform(
        k, shape, jnp.float32, minval=-bound, maxval=bound)
    return {
        "w_ih": u(ks[0], (4 * hidden_size, input_size)),
        "w_hh": u(ks[1], (4 * hidden_size, hidden_size)),
        "b_ih": u(ks[2], (4 * hidden_size,)),
        "b_hh": u(ks[3], (4 * hidden_size,)),
        "w_fc": u(ks[4], (num_classes, hidden_size)),
        "b_fc": u(ks[5], (num_classes,)),
    }


if __name__ == "__main__":
    # Small shapes consistent with the module's forward (B, T, input_size).
    B, T, F, H, C = 2, 8, 64, 32, 6

    key = jax.random.PRNGKey(0)
    k_x, k_p = jax.random.split(key)
    x = jax.random.normal(k_x, (B, T, F), jnp.float32)
    params = _init_params(k_p, F, H, C)

    out = jax.block_until_ready(action_recognition_lstm(x, params))
    ref = _reference(x, params)

    assert out.shape == (B, C)
    err = jnp.max(jnp.abs(out - ref))
    assert jnp.allclose(out, ref, atol=1e-4, rtol=1e-4), f"max abs err {err}"
    print("KERNEL_OK")
</pallas_src>

<mosaic_0001>
module attributes {stable_mosaic.version = 11 : i64} {
  func.func @_lstm_fc_kernel(%arg0: memref<64x64xf32, #tpu.memory_space<vmem>>, %arg1: memref<64x512xf32, #tpu.memory_space<vmem>>, %arg2: memref<128x512xf32, #tpu.memory_space<vmem>>, %arg3: memref<1x512xf32, #tpu.memory_space<vmem>>, %arg4: memref<128x128xf32, #tpu.memory_space<vmem>>, %arg5: memref<1x128xf32, #tpu.memory_space<vmem>>, %arg6: memref<8x128xf32, #tpu.memory_space<vmem>>) attributes {dimension_semantics = [], scalar_prefetch = 0 : i64, scratch_operands = 0 : i64, tpu.core_type = #tpu.core_type<tc>} {
    %c0 = arith.constant 0 : index
    %c0_0 = arith.constant 0 : index
    %0 = vector.load %arg0[%c0, %c0_0] : memref<64x64xf32, #tpu.memory_space<vmem>>, vector<64x64xf32>
    %c0_1 = arith.constant 0 : index
    %c0_2 = arith.constant 0 : index
    %1 = vector.load %arg1[%c0_1, %c0_2] : memref<64x512xf32, #tpu.memory_space<vmem>>, vector<64x512xf32>
    %cst = arith.constant dense<0.000000e+00> : vector<64x512xf32>
    %2 = tpu.matmul %0, %1, %cst {dimension_numbers = #tpu.dot_dimension_numbers<[1], [0], [0], [1], [0, 0, 1, 1], [], []>} : vector<64x64xf32>, vector<64x512xf32>, vector<64x512xf32> -> vector<64x512xf32>
    %c0_3 = arith.constant 0 : index
    %c0_4 = arith.constant 0 : index
    %3 = vector.load %arg3[%c0_3, %c0_4] : memref<1x512xf32, #tpu.memory_space<vmem>>, vector<1x512xf32>
    %4 = vector.broadcast %3 : vector<1x512xf32> to vector<64x512xf32>
    %5 = arith.addf %2, %4 : vector<64x512xf32>
    %c0_5 = arith.constant 0 : index
    %c0_6 = arith.constant 0 : index
    %6 = vector.load %arg2[%c0_5, %c0_6] : memref<128x512xf32, #tpu.memory_space<vmem>>, vector<128x512xf32>
    %cst_7 = arith.constant 0.000000e+00 : f32
    %7 = vector.broadcast %cst_7 : f32 to vector<8x128xf32>
    %cst_8 = arith.constant 0.000000e+00 : f32
    %8 = vector.broadcast %cst_8 : f32 to vector<8x128xf32>
    %9 = vector.extract_strided_slice %5 {offsets = [0, 0], sizes = [8, 512], strides = [1, 1]} : vector<64x512xf32> to vector<8x512xf32>
    %cst_9 = arith.constant dense<0.000000e+00> : vector<8x512xf32>
    %10 = tpu.matmul %7, %6, %cst_9 {dimension_numbers = #tpu.dot_dimension_numbers<[1], [0], [0], [1], [0, 0, 1, 1], [], []>} : vector<8x128xf32>, vector<128x512xf32>, vector<8x512xf32> -> vector<8x512xf32>
    %11 = arith.addf %9, %10 : vector<8x512xf32>
    %12 = vector.extract_strided_slice %11 {offsets = [0, 0], sizes = [8, 128], strides = [1, 1]} : vector<8x512xf32> to vector<8x128xf32>
    %13 = arith.negf %12 : vector<8x128xf32>
    %14 = math.exp %13 : vector<8x128xf32>
    %cst_10 = arith.constant 1.000000e+00 : f32
    %15 = vector.broadcast %cst_10 : f32 to vector<8x128xf32>
    %16 = arith.addf %15, %14 : vector<8x128xf32>
    %17 = arith.divf %15, %16 : vector<8x128xf32>
    %18 = vector.extract_strided_slice %11 {offsets = [0, 128], sizes = [8, 128], strides = [1, 1]} : vector<8x512xf32> to vector<8x128xf32>
    %19 = arith.negf %18 : vector<8x128xf32>
    %20 = math.exp %19 : vector<8x128xf32>
    %cst_11 = arith.constant 1.000000e+00 : f32
    %21 = vector.broadcast %cst_11 : f32 to vector<8x128xf32>
    %22 = arith.addf %21, %20 : vector<8x128xf32>
    %23 = arith.divf %21, %22 : vector<8x128xf32>
    %24 = vector.extract_strided_slice %11 {offsets = [0, 256], sizes = [8, 128], strides = [1, 1]} : vector<8x512xf32> to vector<8x128xf32>
    %25 = math.tanh %24 : vector<8x128xf32>
    %26 = vector.extract_strided_slice %11 {offsets = [0, 384], sizes = [8, 128], strides = [1, 1]} : vector<8x512xf32> to vector<8x128xf32>
    %27 = arith.negf %26 : vector<8x128xf32>
    %28 = math.exp %27 : vector<8x128xf32>
    %cst_12 = arith.constant 1.000000e+00 : f32
    %29 = vector.broadcast %cst_12 : f32 to vector<8x128xf32>
    %30 = arith.addf %29, %28 : vector<8x128xf32>
    %31 = arith.divf %29, %30 : vector<8x128xf32>
    %32 = arith.mulf %23, %8 : vector<8x128xf32>
    %33 = arith.mulf %17, %25 : vector<8x128xf32>
    %34 = arith.addf %32, %33 : vector<8x128xf32>
    %35 = math.tanh %34 : vector<8x128xf32>
    %36 = arith.mulf %31, %35 : vector<8x128xf32>
    %37 = vector.extract_strided_slice %5 {offsets = [8, 0], sizes = [8, 512], strides = [1, 1]} : vector<64x512xf32> to vector<8x512xf32>
    %cst_13 = arith.constant dense<0.000000e+00> : vector<8x512xf32>
    %38 = tpu.matmul %36, %6, %cst_13 {dimension_numbers = #tpu.dot_dimension_numbers<[1], [0], [0], [1], [0, 0, 1, 1], [], []>} : vector<8x128xf32>, vector<128x512xf32>, vector<8x512xf32> -> vector<8x512xf32>
    %39 = arith.addf %37, %38 : vector<8x512xf32>
    %40 = vector.extract_strided_slice %39 {offsets = [0, 0], sizes = [8, 128], strides = [1, 1]} : vector<8x512xf32> to vector<8x128xf32>
    %41 = arith.negf %40 : vector<8x128xf32>
    %42 = math.exp %41 : vector<8x128xf32>
    %cst_14 = arith.constant 1.000000e+00 : f32
    %43 = vector.broadcast %cst_14 : f32 to vector<8x128xf32>
    %44 = arith.addf %43, %42 : vector<8x128xf32>
    %45 = arith.divf %43, %44 : vector<8x128xf32>
    %46 = vector.extract_strided_slice %39 {offsets = [0, 128], sizes = [8, 128], strides = [1, 1]} : vector<8x512xf32> to vector<8x128xf32>
    %47 = arith.negf %46 : vector<8x128xf32>
    %48 = math.exp %47 : vector<8x128xf32>
    %cst_15 = arith.constant 1.000000e+00 : f32
    %49 = vector.broadcast %cst_15 : f32 to vector<8x128xf32>
    %50 = arith.addf %49, %48 : vector<8x128xf32>
    %51 = arith.divf %49, %50 : vector<8x128xf32>
    %52 = vector.extract_strided_slice %39 {offsets = [0, 256], sizes = [8, 128], strides = [1, 1]} : vector<8x512xf32> to vector<8x128xf32>
    %53 = math.tanh %52 : vector<8x128xf32>
    %54 = vector.extract_strided_slice %39 {offsets = [0, 384], sizes = [8, 128], strides = [1, 1]} : vector<8x512xf32> to vector<8x128xf32>
    %55 = arith.negf %54 : vector<8x128xf32>
    %56 = math.exp %55 : vector<8x128xf32>
    %cst_16 = arith.constant 1.000000e+00 : f32
    %57 = vector.broadcast %cst_16 : f32 to vector<8x128xf32>
    %58 = arith.addf %57, %56 : vector<8x128xf32>
    %59 = arith.divf %57, %58 : vector<8x128xf32>
    %60 = arith.mulf %51, %34 : vector<8x128xf32>
    %61 = arith.mulf %45, %53 : vector<8x128xf32>
    %62 = arith.addf %60, %61 : vector<8x128xf32>
    %63 = math.tanh %62 : vector<8x128xf32>
    %64 = arith.mulf %59, %63 : vector<8x128xf32>
    %65 = vector.extract_strided_slice %5 {offsets = [16, 0], sizes = [8, 512], strides = [1, 1]} : vector<64x512xf32> to vector<8x512xf32>
    %cst_17 = arith.constant dense<0.000000e+00> : vector<8x512xf32>
    %66 = tpu.matmul %64, %6, %cst_17 {dimension_numbers = #tpu.dot_dimension_numbers<[1], [0], [0], [1], [0, 0, 1, 1], [], []>} : vector<8x128xf32>, vector<128x512xf32>, vector<8x512xf32> -> vector<8x512xf32>
    %67 = arith.addf %65, %66 : vector<8x512xf32>
    %68 = vector.extract_strided_slice %67 {offsets = [0, 0], sizes = [8, 128], strides = [1, 1]} : vector<8x512xf32> to vector<8x128xf32>
    %69 = arith.negf %68 : vector<8x128xf32>
    %70 = math.exp %69 : vector<8x128xf32>
    %cst_18 = arith.constant 1.000000e+00 : f32
    %71 = vector.broadcast %cst_18 : f32 to vector<8x128xf32>
    %72 = arith.addf %71, %70 : vector<8x128xf32>
    %73 = arith.divf %71, %72 : vector<8x128xf32>
    %74 = vector.extract_strided_slice %67 {offsets = [0, 128], sizes = [8, 128], strides = [1, 1]} : vector<8x512xf32> to vector<8x128xf32>
    %75 = arith.negf %74 : vector<8x128xf32>
    %76 = math.exp %75 : vector<8x128xf32>
    %cst_19 = arith.constant 1.000000e+00 : f32
    %77 = vector.broadcast %cst_19 : f32 to vector<8x128xf32>
    %78 = arith.addf %77, %76 : vector<8x128xf32>
    %79 = arith.divf %77, %78 : vector<8x128xf32>
    %80 = vector.extract_strided_slice %67 {offsets = [0, 256], sizes = [8, 128], strides = [1, 1]} : vector<8x512xf32> to vector<8x128xf32>
    %81 = math.tanh %80 : vector<8x128xf32>
    %82 = vector.extract_strided_slice %67 {offsets = [0, 384], sizes = [8, 128], strides = [1, 1]} : vector<8x512xf32> to vector<8x128xf32>
    %83 = arith.negf %82 : vector<8x128xf32>
    %84 = math.exp %83 : vector<8x128xf32>
    %cst_20 = arith.constant 1.000000e+00 : f32
    %85 = vector.broadcast %cst_20 : f32 to vector<8x128xf32>
    %86 = arith.addf %85, %84 : vector<8x128xf32>
    %87 = arith.divf %85, %86 : vector<8x128xf32>
    %88 = arith.mulf %79, %62 : vector<8x128xf32>
    %89 = arith.mulf %73, %81 : vector<8x128xf32>
    %90 = arith.addf %88, %89 : vector<8x128xf32>
    %91 = math.tanh %90 : vector<8x128xf32>
    %92 = arith.mulf %87, %91 : vector<8x128xf32>
    %93 = vector.extract_strided_slice %5 {offsets = [24, 0], sizes = [8, 512], strides = [1, 1]} : vector<64x512xf32> to vector<8x512xf32>
    %cst_21 = arith.constant dense<0.000000e+00> : vector<8x512xf32>
    %94 = tpu.matmul %92, %6, %cst_21 {dimension_numbers = #tpu.dot_dimension_numbers<[1], [0], [0], [1], [0, 0, 1, 1], [], []>} : vector<8x128xf32>, vector<128x512xf32>, vector<8x512xf32> -> vector<8x512xf32>
    %95 = arith.addf %93, %94 : vector<8x512xf32>
    %96 = vector.extract_strided_slice %95 {offsets = [0, 0], sizes = [8, 128], strides = [1, 1]} : vector<8x512xf32> to vector<8x128xf32>
    %97 = arith.negf %96 : vector<8x128xf32>
    %98 = math.exp %97 : vector<8x128xf32>
    %cst_22 = arith.constant 1.000000e+00 : f32
    %99 = vector.broadcast %cst_22 : f32 to vector<8x128xf32>
    %100 = arith.addf %99, %98 : vector<8x128xf32>
    %101 = arith.divf %99, %100 : vector<8x128xf32>
    %102 = vector.extract_strided_slice %95 {offsets = [0, 128], sizes = [8, 128], strides = [1, 1]} : vector<8x512xf32> to vector<8x128xf32>
    %103 = arith.negf %102 : vector<8x128xf32>
    %104 = math.exp %103 : vector<8x128xf32>
    %cst_23 = arith.constant 1.000000e+00 : f32
    %105 = vector.broadcast %cst_23 : f32 to vector<8x128xf32>
    %106 = arith.addf %105, %104 : vector<8x128xf32>
    %107 = arith.divf %105, %106 : vector<8x128xf32>
    %108 = vector.extract_strided_slice %95 {offsets = [0, 256], sizes = [8, 128], strides = [1, 1]} : vector<8x512xf32> to vector<8x128xf32>
    %109 = math.tanh %108 : vector<8x128xf32>
    %110 = vector.extract_strided_slice %95 {offsets = [0, 384], sizes = [8, 128], strides = [1, 1]} : vector<8x512xf32> to vector<8x128xf32>
    %111 = arith.negf %110 : vector<8x128xf32>
    %112 = math.exp %111 : vector<8x128xf32>
    %cst_24 = arith.constant 1.000000e+00 : f32
    %113 = vector.broadcast %cst_24 : f32 to vector<8x128xf32>
    %114 = arith.addf %113, %112 : vector<8x128xf32>
    %115 = arith.divf %113, %114 : vector<8x128xf32>
    %116 = arith.mulf %107, %90 : vector<8x128xf32>
    %117 = arith.mulf %101, %109 : vector<8x128xf32>
    %118 = arith.addf %116, %117 : vector<8x128xf32>
    %119 = math.tanh %118 : vector<8x128xf32>
    %120 = arith.mulf %115, %119 : vector<8x128xf32>
    %121 = vector.extract_strided_slice %5 {offsets = [32, 0], sizes = [8, 512], strides = [1, 1]} : vector<64x512xf32> to vector<8x512xf32>
    %cst_25 = arith.constant dense<0.000000e+00> : vector<8x512xf32>
    %122 = tpu.matmul %120, %6, %cst_25 {dimension_numbers = #tpu.dot_dimension_numbers<[1], [0], [0], [1], [0, 0, 1, 1], [], []>} : vector<8x128xf32>, vector<128x512xf32>, vector<8x512xf32> -> vector<8x512xf32>
    %123 = arith.addf %121, %122 : vector<8x512xf32>
    %124 = vector.extract_strided_slice %123 {offsets = [0, 0], sizes = [8, 128], strides = [1, 1]} : vector<8x512xf32> to vector<8x128xf32>
    %125 = arith.negf %124 : vector<8x128xf32>
    %126 = math.exp %125 : vector<8x128xf32>
    %cst_26 = arith.constant 1.000000e+00 : f32
    %127 = vector.broadcast %cst_26 : f32 to vector<8x128xf32>
    %128 = arith.addf %127, %126 : vector<8x128xf32>
    %129 = arith.divf %127, %128 : vector<8x128xf32>
    %130 = vector.extract_strided_slice %123 {offsets = [0, 128], sizes = [8, 128], strides = [1, 1]} : vector<8x512xf32> to vector<8x128xf32>
    %131 = arith.negf %130 : vector<8x128xf32>
    %132 = math.exp %131 : vector<8x128xf32>
    %cst_27 = arith.constant 1.000000e+00 : f32
    %133 = vector.broadcast %cst_27 : f32 to vector<8x128xf32>
    %134 = arith.addf %133, %132 : vector<8x128xf32>
    %135 = arith.divf %133, %134 : vector<8x128xf32>
    %136 = vector.extract_strided_slice %123 {offsets = [0, 256], sizes = [8, 128], strides = [1, 1]} : vector<8x512xf32> to vector<8x128xf32>
    %137 = math.tanh %136 : vector<8x128xf32>
    %138 = vector.extract_strided_slice %123 {offsets = [0, 384], sizes = [8, 128], strides = [1, 1]} : vector<8x512xf32> to vector<8x128xf32>
    %139 = arith.negf %138 : vector<8x128xf32>
    %140 = math.exp %139 : vector<8x128xf32>
    %cst_28 = arith.constant 1.000000e+00 : f32
    %141 = vector.broadcast %cst_28 : f32 to vector<8x128xf32>
    %142 = arith.addf %141, %140 : vector<8x128xf32>
    %143 = arith.divf %141, %142 : vector<8x128xf32>
    %144 = arith.mulf %135, %118 : vector<8x128xf32>
    %145 = arith.mulf %129, %137 : vector<8x128xf32>
    %146 = arith.addf %144, %145 : vector<8x128xf32>
    %147 = math.tanh %146 : vector<8x128xf32>
    %148 = arith.mulf %143, %147 : vector<8x128xf32>
    %149 = vector.extract_strided_slice %5 {offsets = [40, 0], sizes = [8, 512], strides = [1, 1]} : vector<64x512xf32> to vector<8x512xf32>
    %cst_29 = arith.constant dense<0.000000e+00> : vector<8x512xf32>
    %150 = tpu.matmul %148, %6, %cst_29 {dimension_numbers = #tpu.dot_dimension_numbers<[1], [0], [0], [1], [0, 0, 1, 1], [], []>} : vector<8x128xf32>, vector<128x512xf32>, vector<8x512xf32> -> vector<8x512xf32>
    %151 = arith.addf %149, %150 : vector<8x512xf32>
    %152 = vector.extract_strided_slice %151 {offsets = [0, 0], sizes = [8, 128], strides = [1, 1]} : vector<8x512xf32> to vector<8x128xf32>
    %153 = arith.negf %152 : vector<8x128xf32>
    %154 = math.exp %153 : vector<8x128xf32>
    %cst_30 = arith.constant 1.000000e+00 : f32
    %155 = vector.broadcast %cst_30 : f32 to vector<8x128xf32>
    %156 = arith.addf %155, %154 : vector<8x128xf32>
    %157 = arith.divf %155, %156 : vector<8x128xf32>
    %158 = vector.extract_strided_slice %151 {offsets = [0, 128], sizes = [8, 128], strides = [1, 1]} : vector<8x512xf32> to vector<8x128xf32>
    %159 = arith.negf %158 : vector<8x128xf32>
    %160 = math.exp %159 : vector<8x128xf32>
    %cst_31 = arith.constant 1.000000e+00 : f32
    %161 = vector.broadcast %cst_31 : f32 to vector<8x128xf32>
    %162 = arith.addf %161, %160 : vector<8x128xf32>
    %163 = arith.divf %161, %162 : vector<8x128xf32>
    %164 = vector.extract_strided_slice %151 {offsets = [0, 256], sizes = [8, 128], strides = [1, 1]} : vector<8x512xf32> to vector<8x128xf32>
    %165 = math.tanh %164 : vector<8x128xf32>
    %166 = vector.extract_strided_slice %151 {offsets = [0, 384], sizes = [8, 128], strides = [1, 1]} : vector<8x512xf32> to vector<8x128xf32>
    %167 = arith.negf %166 : vector<8x128xf32>
    %168 = math.exp %167 : vector<8x128xf32>
    %cst_32 = arith.constant 1.000000e+00 : f32
    %169 = vector.broadcast %cst_32 : f32 to vector<8x128xf32>
    %170 = arith.addf %169, %168 : vector<8x128xf32>
    %171 = arith.divf %169, %170 : vector<8x128xf32>
    %172 = arith.mulf %163, %146 : vector<8x128xf32>
    %173 = arith.mulf %157, %165 : vector<8x128xf32>
    %174 = arith.addf %172, %173 : vector<8x128xf32>
    %175 = math.tanh %174 : vector<8x128xf32>
    %176 = arith.mulf %171, %175 : vector<8x128xf32>
    %177 = vector.extract_strided_slice %5 {offsets = [48, 0], sizes = [8, 512], strides = [1, 1]} : vector<64x512xf32> to vector<8x512xf32>
    %cst_33 = arith.constant dense<0.000000e+00> : vector<8x512xf32>
    %178 = tpu.matmul %176, %6, %cst_33 {dimension_numbers = #tpu.dot_dimension_numbers<[1], [0], [0], [1], [0, 0, 1, 1], [], []>} : vector<8x128xf32>, vector<128x512xf32>, vector<8x512xf32> -> vector<8x512xf32>
    %179 = arith.addf %177, %178 : vector<8x512xf32>
    %180 = vector.extract_strided_slice %179 {offsets = [0, 0], sizes = [8, 128], strides = [1, 1]} : vector<8x512xf32> to vector<8x128xf32>
    %181 = arith.negf %180 : vector<8x128xf32>
    %182 = math.exp %181 : vector<8x128xf32>
    %cst_34 = arith.constant 1.000000e+00 : f32
    %183 = vector.broadcast %cst_34 : f32 to vector<8x128xf32>
    %184 = arith.addf %183, %182 : vector<8x128xf32>
    %185 = arith.divf %183, %184 : vector<8x128xf32>
    %186 = vector.extract_strided_slice %179 {offsets = [0, 128], sizes = [8, 128], strides = [1, 1]} : vector<8x512xf32> to vector<8x128xf32>
    %187 = arith.negf %186 : vector<8x128xf32>
    %188 = math.exp %187 : vector<8x128xf32>
    %cst_35 = arith.constant 1.000000e+00 : f32
    %189 = vector.broadcast %cst_35 : f32 to vector<8x128xf32>
    %190 = arith.addf %189, %188 : vector<8x128xf32>
    %191 = arith.divf %189, %190 : vector<8x128xf32>
    %192 = vector.extract_strided_slice %179 {offsets = [0, 256], sizes = [8, 128], strides = [1, 1]} : vector<8x512xf32> to vector<8x128xf32>
    %193 = math.tanh %192 : vector<8x128xf32>
    %194 = vector.extract_strided_slice %179 {offsets = [0, 384], sizes = [8, 128], strides = [1, 1]} : vector<8x512xf32> to vector<8x128xf32>
    %195 = arith.negf %194 : vector<8x128xf32>
    %196 = math.exp %195 : vector<8x128xf32>
    %cst_36 = arith.constant 1.000000e+00 : f32
    %197 = vector.broadcast %cst_36 : f32 to vector<8x128xf32>
    %198 = arith.addf %197, %196 : vector<8x128xf32>
    %199 = arith.divf %197, %198 : vector<8x128xf32>
    %200 = arith.mulf %191, %174 : vector<8x128xf32>
    %201 = arith.mulf %185, %193 : vector<8x128xf32>
    %202 = arith.addf %200, %201 : vector<8x128xf32>
    %203 = math.tanh %202 : vector<8x128xf32>
    %204 = arith.mulf %199, %203 : vector<8x128xf32>
    %205 = vector.extract_strided_slice %5 {offsets = [56, 0], sizes = [8, 512], strides = [1, 1]} : vector<64x512xf32> to vector<8x512xf32>
    %cst_37 = arith.constant dense<0.000000e+00> : vector<8x512xf32>
    %206 = tpu.matmul %204, %6, %cst_37 {dimension_numbers = #tpu.dot_dimension_numbers<[1], [0], [0], [1], [0, 0, 1, 1], [], []>} : vector<8x128xf32>, vector<128x512xf32>, vector<8x512xf32> -> vector<8x512xf32>
    %207 = arith.addf %205, %206 : vector<8x512xf32>
    %208 = vector.extract_strided_slice %207 {offsets = [0, 0], sizes = [8, 128], strides = [1, 1]} : vector<8x512xf32> to vector<8x128xf32>
    %209 = arith.negf %208 : vector<8x128xf32>
    %210 = math.exp %209 : vector<8x128xf32>
    %cst_38 = arith.constant 1.000000e+00 : f32
    %211 = vector.broadcast %cst_38 : f32 to vector<8x128xf32>
    %212 = arith.addf %211, %210 : vector<8x128xf32>
    %213 = arith.divf %211, %212 : vector<8x128xf32>
    %214 = vector.extract_strided_slice %207 {offsets = [0, 128], sizes = [8, 128], strides = [1, 1]} : vector<8x512xf32> to vector<8x128xf32>
    %215 = arith.negf %214 : vector<8x128xf32>
    %216 = math.exp %215 : vector<8x128xf32>
    %cst_39 = arith.constant 1.000000e+00 : f32
    %217 = vector.broadcast %cst_39 : f32 to vector<8x128xf32>
    %218 = arith.addf %217, %216 : vector<8x128xf32>
    %219 = arith.divf %217, %218 : vector<8x128xf32>
    %220 = vector.extract_strided_slice %207 {offsets = [0, 256], sizes = [8, 128], strides = [1, 1]} : vector<8x512xf32> to vector<8x128xf32>
    %221 = math.tanh %220 : vector<8x128xf32>
    %222 = vector.extract_strided_slice %207 {offsets = [0, 384], sizes = [8, 128], strides = [1, 1]} : vector<8x512xf32> to vector<8x128xf32>
    %223 = arith.negf %222 : vector<8x128xf32>
    %224 = math.exp %223 : vector<8x128xf32>
    %cst_40 = arith.constant 1.000000e+00 : f32
    %225 = vector.broadcast %cst_40 : f32 to vector<8x128xf32>
    %226 = arith.addf %225, %224 : vector<8x128xf32>
    %227 = arith.divf %225, %226 : vector<8x128xf32>
    %228 = arith.mulf %219, %202 : vector<8x128xf32>
    %229 = arith.mulf %213, %221 : vector<8x128xf32>
    %230 = arith.addf %228, %229 : vector<8x128xf32>
    %231 = math.tanh %230 : vector<8x128xf32>
    %232 = arith.mulf %227, %231 : vector<8x128xf32>
    %c0_41 = arith.constant 0 : index
    %c0_42 = arith.constant 0 : index
    %233 = vector.load %arg4[%c0_41, %c0_42] : memref<128x128xf32, #tpu.memory_space<vmem>>, vector<128x128xf32>
    %cst_43 = arith.constant dense<0.000000e+00> : vector<8x128xf32>
    %234 = tpu.matmul %232, %233, %cst_43 {dimension_numbers = #tpu.dot_dimension_numbers<[1], [0], [0], [1], [0, 0, 1, 1], [], []>} : vector<8x128xf32>, vector<128x128xf32>, vector<8x128xf32> -> vector<8x128xf32>
    %c0_44 = arith.constant 0 : index
    %c0_45 = arith.constant 0 : index
    %235 = vector.load %arg5[%c0_44, %c0_45] : memref<1x128xf32, #tpu.memory_space<vmem>>, vector<1x128xf32>
    %236 = vector.broadcast %235 : vector<1x128xf32> to vector<8x128xf32>
    %237 = arith.addf %234, %236 : vector<8x128xf32>
    %c0_46 = arith.constant 0 : index
    %c0_47 = arith.constant 0 : index
    %238 = vector.load %arg6[%c0_46, %c0_47] : memref<8x128xf32, #tpu.memory_space<vmem>>, vector<8x128xf32>
    tpu.vector_store %arg6[%c0_46, %c0_47], %237 {strides = array<i32>} : memref<8x128xf32, #tpu.memory_space<vmem>>, vector<8x128xf32>,
    return
  }
}

</mosaic_0001>

<bundles_post_ra>
// kernel: tpu_custom_call.1
= control target key start
LH: loop header
LB: loop body
LE: loop exit
PB: predicated region body
PF: predicated region fallthrough
CT: control target
= control target key end

     0   :  { %11 = vsyncpa [#allocation3], 0  ;;  %s3481_s0 = inlined_call_operand.hbm [shape: f32[64,64], index: 0, kind: input, shape index: {}]   ;;  %s3482_s1 = inlined_call_operand.hbm [shape: f32[64,512], index: 1, kind: input, shape index: {}]   ;;  %s3483_s2 = inlined_call_operand.hbm [shape: f32[128,512], index: 2, kind: input, shape index: {}]   ;;  %s3484_s3 = inlined_call_operand.vmem [shape: f32[1,512], index: 3, kind: input, shape index: {}]   ;;  %s3485_s4 = inlined_call_operand.hbm [shape: f32[128,128], index: 4, kind: input, shape index: {}]   ;;  %s3486_s5 = inlined_call_operand.vmem [shape: f32[1,128], index: 5, kind: input, shape index: {}]   ;;  %s3487_s6 = inlined_call_operand.hbm [shape: f32[8,128], index: 6, kind: output, shape index: {}]  }
   0x1   :  { %12 = vsyncpa [#allocation6], 0 }
   0x2   :  { %13 = vsyncpa [#allocation9], 0 }
   0x3   :  { %14 = vsyncpa [#allocation4], 0  ;;  %s2910_s21 = smov [#allocation5]   ;;  %s2792_s25 = scalar_lea.hbm %s3482_s1, 4096 }
   0x4   :  { %s32_s22 = sshll.u32 %s2910_s21, 4  ;;  %p2793_p0 = scmp.ne.s32.totalorder %s3482_s1, %s2792_s25  ;;  %s33_s22 = int_to_ptr.vmem [resolvable:$true] %s32_s22 }
   0x5   :  { %p2796_p1 = scmp.lt.u32.totalorder %s2792_s25, %s3482_s1 }
   0x7   :  { %p2798_p2 = pnand %p2796_p1, %p2793_p0 }
   0x9   :  { %2801 = shalt.err (!%p2798_p2)
}
   0xa   :  { %s2802_s30 = scalar_lea.vmem %s33_s22, 4096  ;;  %p2807_p4 = scmp.lt.s32.totalorder %s33_s22, %s33_s22 }
   0xb   :  { %p2803_p3 = scmp.ne.s32.totalorder %s33_s22, %s2802_s30  ;;  %p2808_p5 = scmp.lt.s32.totalorder %s2802_s30, %s2802_s30 }
   0xd   :  { %p2809_p6 = por %p2808_p5, %p2807_p4 }
   0xf   :  { %p2810_p7 = pnand %p2809_p6, %p2803_p3 }
  0x11   :  { %2813 = shalt.err (!%p2810_p7)
}
  0x12   :  { %s2911_s7 = smov 512   ;;  %s2912_s8 = smov 32  }
  0x13   :  { %38 = dma.hbm_to_vmem [thread:$0]  %s3482_s1, 4096, %s33_s22, [#allocation6], %s2911_s7, %s2911_s7, %s2912_s8  }
  0x14   :  { %s2913_s11 = smov [#allocation2]   ;;  %s2814_s15 = scalar_lea.hbm %s3481_s0, 1024 }
  0x15   :  { %s20_s12 = sshll.u32 %s2913_s11, 4  ;;  %p2815_p8 = scmp.ne.s32.totalorder %s3481_s0, %s2814_s15  ;;  %s21_s12 = int_to_ptr.vmem [resolvable:$true] %s20_s12 }
  0x16   :  { %p2818_p9 = scmp.lt.u32.totalorder %s2814_s15, %s3481_s0 }
  0x18   :  { %p2820_p10 = pnand %p2818_p9, %p2815_p8 }
  0x1a   :  { %2823 = shalt.err (!%p2820_p10)
}
  0x1b   :  { %s2824_s20 = scalar_lea.vmem %s21_s12, 1024  ;;  %p2829_p12 = scmp.lt.s32.totalorder %s21_s12, %s21_s12 }
  0x1c   :  { %p2825_p11 = scmp.ne.s32.totalorder %s21_s12, %s2824_s20  ;;  %p2830_p13 = scmp.lt.s32.totalorder %s2824_s20, %s2824_s20 }
  0x1e   :  { %p2831_p0 = por %p2830_p13, %p2829_p12 }
  0x20   :  { %p2832_p1 = pnand %p2831_p0, %p2825_p11 }
  0x22   :  { %2835 = shalt.err (!%p2832_p1)
}
  0x23   :  { %s2914_s1 = smov 128   ;;  %s2915_s21 = smov 8  }
  0x24   :  { %26 = dma.hbm_to_vmem [thread:$0]  %s3481_s0, 1024, %s21_s12, [#allocation3], %s2914_s1, %s2914_s1, %s2915_s21  }
  0x25   :  { %s2916_s24 = smov [#allocation7]   ;;  %s2917_s26 = smov [#allocation8]  }
  0x26   :  { %s44_s25 = sshll.u32 %s2916_s24, 4  ;;  %s58_s27 = sshll.u32 %s2917_s26, 4  ;;  %s45_s25 = int_to_ptr.vmem [resolvable:$true] %s44_s25  ;;  %s2987_s27 = int_to_ptr.vmem [resolvable:$true] %s58_s27 }
  0x27   :  { %s2836_s30 = scalar_lea.hbm %s3483_s2, 8192 }
  0x28   :  { %p2837_p2 = scmp.ne.s32.totalorder %s3483_s2, %s2836_s30  ;;  %p2840_p3 = scmp.lt.u32.totalorder %s2836_s30, %s3483_s2 }
  0x2a   :  { %p2842_p4 = pnand %p2840_p3, %p2837_p2 }
  0x2c   :  { %2845 = shalt.err (!%p2842_p4)
}
  0x2d   :  { %s2846_s0 = scalar_lea.vmem %s45_s25, 8192  ;;  %p2851_p6 = scmp.lt.s32.totalorder %s45_s25, %s45_s25 }
  0x2e   :  { %p2847_p5 = scmp.ne.s32.totalorder %s45_s25, %s2846_s0  ;;  %p2852_p7 = scmp.lt.s32.totalorder %s2846_s0, %s2846_s0 }
  0x30   :  { %p2853_p8 = por %p2852_p7, %p2851_p6 }
  0x32   :  { %p2854_p9 = pnand %p2853_p8, %p2847_p5 }
  0x34   :  { %2857 = shalt.err (!%p2854_p9)
}
  0x35   :  { %50 = dma.hbm_to_vmem [thread:$0]  %s3483_s2, 8192, %s45_s25, [#allocation6], %s2911_s7, %s2911_s7, %s2912_s8  }
  0x36   :  { %s2858_s17 = scalar_lea.hbm %s3485_s4, 2048 }
  0x37   :  { %p2859_p10 = scmp.ne.s32.totalorder %s3485_s4, %s2858_s17  ;;  %p2862_p11 = scmp.lt.u32.totalorder %s2858_s17, %s3485_s4 }
  0x39   :  { %p2864_p12 = pnand %p2862_p11, %p2859_p10 }
  0x3b   :  { %2867 = shalt.err (!%p2864_p12)
}
  0x3c   :  { %s2868_s23 = scalar_lea.vmem %s2987_s27, 2048  ;;  %p2873_p0 = scmp.lt.s32.totalorder %s2987_s27, %s2987_s27 }
  0x3d   :  { %p2869_p13 = scmp.ne.s32.totalorder %s2987_s27, %s2868_s23  ;;  %p2874_p1 = scmp.lt.s32.totalorder %s2868_s23, %s2868_s23 }
  0x3f   :  { %p2875_p2 = por %p2874_p1, %p2873_p0 }
  0x41   :  { %p2876_p3 = pnand %p2875_p2, %p2869_p13 }
  0x43   :  { %2879 = shalt.err (!%p2876_p3)
}
  0x44   :  { %64 = dma.hbm_to_vmem [thread:$0]  %s3485_s4, 2048, %s2987_s27, [#allocation9], %s2914_s1, %s2914_s1, %s2915_s21  }
  0x45   :  { %2902 = dma.done.wait [#allocation3], 1024  }
  0x46   :  { %2903 = vsyncadd [#allocation3], 4294966272 }
  0x47   :  { %2904 = dma.done.wait [#allocation6], 12288  }
  0x48   :  { %2905 = vsyncadd [#allocation6], 4294955008 }
  0x49   :  { %2906 = dma.done.wait [#allocation9], 2048  }
  0x4a   :  { %2907 = vsyncadd [#allocation9], 4294965248  ;;  %v2918_v0 = vmov 0.0   ;;  %v88_v1 = vld [vmem:[#allocation5 + $0x8] sm:$0xff]  ;;  %v90_v3 = vld [vmem:[#allocation5 + $0x18] sm:$0xff]  ;;  %vm141_vm0 = vcmask 523264  }
  0x4b   :  { %230 = vmatprep.mubr.f32.mxu0 %v2918_v0  ;;  %343 = vmatprep.mubr.f32.mxu1 %v2918_v0  ;;  %v92_v2 = vld [vmem:[#allocation5 + $0x28] sm:$0xff]  ;;  %v94_v5 = vld [vmem:[#allocation5 + $0x38] sm:$0xff]  ;;  %v87_v6 = vld [vmem:[#allocation5] sm:$0xff]  ;;  %vm2920_vm1 = vmmov 0   ;;  %s2921_s21 = smov [#allocation10]  }
  0x4c   :  { %v2020_v4 = vpack.c.bf16 %v92_v2, %v88_v1  ;;  %v91_v7 = vld [vmem:[#allocation5 + $0x20] sm:$0xff]  ;;  %v2036_v8 = vpack.c.bf16 %v94_v5, %v90_v3  ;;  %v89_v10 = vld [vmem:[#allocation5 + $0x10] sm:$0xff]  ;;  %v96_v12 = vld [vmem:[#allocation5 + $0x48] sm:$0xff]  ;;  %s1916_s24 = sshll.u32 %s2921_s21, 4  ;;  %s1917_s24 = int_to_ptr.vmem [resolvable:$true] %s1916_s24 }
  0x4d   :  { %v2022_v9 = vpack.c.bf16 %v91_v7, %v87_v6  ;;  %v93_v11 = vld [vmem:[#allocation5 + $0x30] sm:$0xff]  ;;  %v100_v14 = vld [vmem:[#allocation5 + $0x68] sm:$0xff]  ;;  %v98_v15 = vld [vmem:[#allocation5 + $0x58] sm:$0xff]  ;;  %s2880_s25 = scalar_lea.vmem %s1917_s24, 128  ;;  %p2885_p5 = scmp.lt.s32.totalorder %s1917_s24, %s1917_s24 }
  0x4e   :  { %2021 = vmatprep.subr.bf16.mxu0 %v2020_v4  ;;  %v2038_v13 = vpack.c.bf16 %v93_v11, %v89_v10  ;;  %v102_v16 = vld [vmem:[#allocation5 + $0x78] sm:$0xff]  ;;  %2037 = vmatprep.subr.bf16.mxu1 %v2036_v8  ;;  %v2024_v17 = vpack.c.bf16 %v100_v14, %v96_v12  ;;  %v95_v19 = vld [vmem:[#allocation5 + $0x40] sm:$0xff]  ;;  %v97_v21 = vld [vmem:[#allocation5 + $0x50] sm:$0xff]  ;;  %p2881_p4 = scmp.ne.s32.totalorder %s1917_s24, %s2880_s25  ;;  %p2886_p6 = scmp.lt.s32.totalorder %s2880_s25, %s2880_s25 }
  0x4f   :  { %2023 = vmatpush1.bf16.msra.mxu0 %v2022_v9  ;;  %v2040_v18 = vpack.c.bf16 %v102_v16, %v98_v15  ;;  %v99_v20 = vld [vmem:[#allocation5 + $0x60] sm:$0xff]  ;;  %v101_v23 = vld [vmem:[#allocation5 + $0x70] sm:$0xff]  ;;  %v104_v24 = vld [vmem:[#allocation5 + $0x88] sm:$0xff] }
  0x50   :  { %2039 = vmatpush1.bf16.msra.mxu1 %v2038_v13  ;;  %v2026_v22 = vpack.c.bf16 %v99_v20, %v95_v19  ;;  %v108_v25 = vld [vmem:[#allocation5 + $0xa8] sm:$0xff]  ;;  %2025 = vmatprep.subr.bf16.mxu0 %v2024_v17  ;;  %v2042_v26 = vpack.c.bf16 %v101_v23, %v97_v21  ;;  %v106_v28 = vld [vmem:[#allocation5 + $0x98] sm:$0xff]  ;;  %v103_v30 = vld [vmem:[#allocation5 + $0x80] sm:$0xff]  ;;  %p2887_p7 = por %p2886_p6, %p2885_p5 }
  0x51   :  { %2041 = vmatprep.subr.bf16.mxu1 %v2040_v18  ;;  %v2028_v27 = vpack.c.bf16 %v108_v25, %v104_v24  ;;  %v110_v29 = vld [vmem:[#allocation5 + $0xb8] sm:$0xff]  ;;  %v107_v32 = vld [vmem:[#allocation5 + $0xa0] sm:$0xff]  ;;  %v105_v33 = vld [vmem:[#allocation5 + $0x90] sm:$0xff] }
  0x52   :  { %v2044_v31 = vpack.c.bf16 %v110_v29, %v106_v28  ;;  %v109_v34 = vld [vmem:[#allocation5 + $0xb0] sm:$0xff]  ;;  %v2030_v35 = vpack.c.bf16 %v107_v32, %v103_v30  ;;  %v112_v36 = vld [vmem:[#allocation5 + $0xc8] sm:$0xff]  ;;  %v114_v38 = vld [vmem:[#allocation5 + $0xd8] sm:$0xff]  ;;  %p2888_p8 = pnand %p2887_p7, %p2881_p4 }
  0x53   :  { %2027 = vmatpush1.bf16.msra.mxu0 %v2026_v22  ;;  %v116_v37 = vld [vmem:[#allocation5 + $0xe8] sm:$0xff]  ;;  %v2046_v39 = vpack.c.bf16 %v109_v34, %v105_v33  ;;  %v118_v41 = vld [vmem:[#allocation5 + $0xf8] sm:$0xff]  ;;  %v111_v42 = vld [vmem:[#allocation5 + $0xc0] sm:$0xff] }
  0x54   :  { %2043 = vmatpush1.bf16.msra.mxu1 %v2042_v26  ;;  %2029 = vmatprep.subr.bf16.mxu0 %v2028_v27  ;;  %v2032_v40 = vpack.c.bf16 %v116_v37, %v112_v36  ;;  %v115_v43 = vld [vmem:[#allocation5 + $0xe0] sm:$0xff]  ;;  %v2048_v44 = vpack.c.bf16 %v118_v41, %v114_v38  ;;  %v113_v45 = vld [vmem:[#allocation5 + $0xd0] sm:$0xff]  ;;  %v393_v47 = vld [vmem:[#allocation7 + $0x8] sm:$0xff] }
  0x55   :  { %2045 = vmatprep.subr.bf16.mxu1 %v2044_v31  ;;  %v117_v46 = vld [vmem:[#allocation5 + $0xf0] sm:$0xff]  ;;  %v397_v48 = vld [vmem:[#allocation7 + $0x28] sm:$0xff]  ;;  %v395_v49 = vld [vmem:[#allocation7 + $0x18] sm:$0xff]  ;;  %v2034_v50 = vpack.c.bf16 %v115_v43, %v111_v42 }
  0x56   :  { %v399_v51 = vld [vmem:[#allocation7 + $0x38] sm:$0xff]  ;;  %v2050_v52 = vpack.c.bf16 %v117_v46, %v113_v45  ;;  %v3026_v53 = vpack.c.bf16 %v397_v48, %v393_v47  ;;  %v392_v54 = vld [vmem:[#allocation7] sm:$0xff]  ;;  %v394_v57 = vld [vmem:[#allocation7 + $0x10] sm:$0xff] }
  0x57   :  { %2031 = vmatpush1.bf16.msra.mxu0 %v2030_v35  ;;  %v396_v55 = vld [vmem:[#allocation7 + $0x20] sm:$0xff]  ;;  %v3028_v56 = vpack.c.bf16 %v399_v51, %v395_v49  ;;  %v398_v58 = vld [vmem:[#allocation7 + $0x30] sm:$0xff]  ;;  %v401_v59 = vld [vmem:[#allocation7 + $0x48] sm:$0xff] }
  0x58   :  { %2047 = vmatpush1.bf16.msra.mxu1 %v2046_v39  ;;  %2033 = vmatprep.subr.bf16.mxu0 %v2032_v40  ;;  %v405_v60 = vld [vmem:[#allocation7 + $0x68] sm:$0xff]  ;;  %v79_v61 = vld [vmem:[#allocation2] sm:$0xff]  ;;  %v3030_v62 = vpack.c.bf16 %v396_v55, %v392_v54  ;;  %v403_v63 = vld [vmem:[#allocation7 + $0x58] sm:$0xff]  ;;  %v3033_v2 = vpack.c.bf16 %v398_v58, %v394_v57 }
  0x59   :  { %2049 = vmatprep.subr.bf16.mxu1 %v2048_v44  ;;  %v407_v1 = vld [vmem:[#allocation7 + $0x78] sm:$0xff]  ;;  %v400_v3 = vld [vmem:[#allocation7 + $0x40] sm:$0xff]  ;;  %v3036_v5 = vpack.c.bf16 %v405_v60, %v401_v59  ;;  %v402_v6 = vld [vmem:[#allocation7 + $0x50] sm:$0xff] }
  0x5a   :  { %v404_v4 = vld [vmem:[#allocation7 + $0x60] sm:$0xff]  ;;  %v406_v7 = vld [vmem:[#allocation7 + $0x70] sm:$0xff]  ;;  %v3039_v8 = vpack.c.bf16 %v407_v1, %v403_v63  ;;  %v409_v9 = vld [vmem:[#allocation7 + $0x88] sm:$0xff] }
  0x5b   :  { %2035 = vmatpush1.bf16.msra.mxu0 %v2034_v50  ;;  %v413_v10 = vld [vmem:[#allocation7 + $0xa8] sm:$0xff]  ;;  %v3043_v12 = vpack.c.bf16 %v404_v4, %v400_v3  ;;  %v411_v13 = vld [vmem:[#allocation7 + $0x98] sm:$0xff]  ;;  %v3047_v15 = vpack.c.bf16 %v406_v7, %v402_v6  ;;  %v408_v16 = vld [vmem:[#allocation7 + $0x80] sm:$0xff] }
  0x5c   :  { %2051 = vmatpush1.bf16.msra.mxu1 %v2050_v52  ;;  %2053 = vmatprep.subr.bf16.mxu0 %v3026_v53  ;;  %v80_v11 = vld [vmem:[#allocation2 + $0x8] sm:$0xff]  ;;  %v415_v14 = vld [vmem:[#allocation7 + $0xb8] sm:$0xff]  ;;  %v412_v17 = vld [vmem:[#allocation7 + $0xa0] sm:$0xff]  ;;  %v3051_v18 = vpack.c.bf16 %v413_v10, %v409_v9 }
  0x5d   :  { %2085 = vmatprep.subr.bf16.mxu1 %v3028_v56  ;;  %v410_v19 = vld [vmem:[#allocation7 + $0x90] sm:$0xff]  ;;  %v3055_v21 = vpack.c.bf16 %v415_v14, %v411_v13  ;;  %v417_v22 = vld [vmem:[#allocation7 + $0xc8] sm:$0xff]  ;;  %v3059_v25 = vpack.c.bf16 %v412_v17, %v408_v16  ;;  %v419_v26 = vld [vmem:[#allocation7 + $0xd8] sm:$0xff] }
  0x5e   :  { %1927 = vmatmul.mubr.msk.f32.vlgmr.msra.gmra.mrb[0].mxu0 %vm141_vm0, %v79_v61  ;;  %v414_v20 = vld [vmem:[#allocation7 + $0xb0] sm:$0xff]  ;;  %v421_v23 = vld [vmem:[#allocation7 + $0xe8] sm:$0xff]  ;;  %v423_v27 = vld [vmem:[#allocation7 + $0xf8] sm:$0xff] }
  0x5f   :  { %1935 = vmatmul.mubr.msk.f32.vlgmr.msra.gmra.mrb[0].mxu1 %vm141_vm0, %v79_v61  ;;  %2055 = vmatpush1.bf16.msra.mxu0 %v3030_v62  ;;  %v81_v24 = vld [vmem:[#allocation2 + $0x10] sm:$0xff]  ;;  %v3063_v28 = vpack.c.bf16 %v414_v20, %v410_v19  ;;  %v416_v29 = vld [vmem:[#allocation7 + $0xc0] sm:$0xff]  ;;  %v3067_v31 = vpack.c.bf16 %v421_v23, %v417_v22  ;;  %v3071_v34 = vpack.c.bf16 %v423_v27, %v419_v26  ;;  %v425_v35 = vld [vmem:[#allocation7 + $0x108] sm:$0xff] }
  0x60   :  { %2087 = vmatpush1.bf16.msra.mxu1 %v3033_v2  ;;  %236 = vmatprep.mubr.f32.mxu0 %v2918_v0  ;;  %v420_v30 = vld [vmem:[#allocation7 + $0xe0] sm:$0xff]  ;;  %v418_v32 = vld [vmem:[#allocation7 + $0xd0] sm:$0xff]  ;;  %v429_v36 = vld [vmem:[#allocation7 + $0x128] sm:$0xff] }
  0x61   :  { %349 = vmatprep.mubr.f32.mxu1 %v2918_v0  ;;  %2057 = vmatprep.subr.bf16.mxu0 %v3036_v5  ;;  %v422_v33 = vld [vmem:[#allocation7 + $0xf0] sm:$0xff]  ;;  %v82_v37 = vld [vmem:[#allocation2 + $0x18] sm:$0xff]  ;;  %v3075_v38 = vpack.c.bf16 %v420_v30, %v416_v29  ;;  %v424_v42 = vld [vmem:[#allocation7 + $0x100] sm:$0xff]  ;;  %v3083_v44 = vpack.c.bf16 %v429_v36, %v425_v35 }
  0x62   :  { %1928 = vmatmul.mubr.msk.f32.gmra.mrb[2].mxu0 %vm141_vm0, %v80_v11  ;;  %2089 = vmatprep.subr.bf16.mxu1 %v3039_v8  ;;  %v427_v39 = vld [vmem:[#allocation7 + $0x118] sm:$0xff]  ;;  %v3079_v41 = vpack.c.bf16 %v422_v33, %v418_v32  ;;  %v428_v43 = vld [vmem:[#allocation7 + $0x120] sm:$0xff]  ;;  %v426_v45 = vld [vmem:[#allocation7 + $0x110] sm:$0xff] }
  0x63   :  { %1936 = vmatmul.mubr.msk.f32.gmra.mrb[2].mxu1 %vm141_vm0, %v80_v11  ;;  %2059 = vmatpush1.bf16.msra.mxu0 %v3043_v12  ;;  %v431_v40 = vld [vmem:[#allocation7 + $0x138] sm:$0xff]  ;;  %v430_v46 = vld [vmem:[#allocation7 + $0x130] sm:$0xff]  ;;  %v433_v48 = vld [vmem:[#allocation7 + $0x148] sm:$0xff]  ;;  %v3091_v51 = vpack.c.bf16 %v428_v43, %v424_v42  ;;  %v121_v43 = vlaneseq }
  0x64   :  { %2091 = vmatpush1.bf16.msra.mxu1 %v3047_v15  ;;  %242 = vmatprep.mubr.f32.mxu0 %v2918_v0  ;;  %v3087_v47 = vpack.c.bf16 %v431_v40, %v427_v39  ;;  %v437_v49 = vld [vmem:[#allocation7 + $0x168] sm:$0xff]  ;;  %v83_v50 = vld [vmem:[#allocation2 + $0x20] sm:$0xff]  ;;  %v435_v52 = vld [vmem:[#allocation7 + $0x158] sm:$0xff]  ;;  %v3095_v55 = vpack.c.bf16 %v430_v46, %v426_v45 }
  0x65   :  { %355 = vmatprep.mubr.f32.mxu1 %v2918_v0  ;;  %2061 = vmatprep.subr.bf16.mxu0 %v3051_v18  ;;  %v439_v54 = vld [vmem:[#allocation7 + $0x178] sm:$0xff]  ;;  %v432_v57 = vld [vmem:[#allocation7 + $0x140] sm:$0xff]  ;;  %v3099_v59 = vpack.c.bf16 %v437_v49, %v433_v48  ;;  %v434_v60 = vld [vmem:[#allocation7 + $0x150] sm:$0xff]  ;;  %v122_v45 = vshrl.u32 %v121_v43, 7 }
  0x66   :  { %1929 = vmatmul.mubr.msk.f32.gmra.mrb[4].mxu0 %vm141_vm0, %v81_v24  ;;  %2093 = vmatprep.subr.bf16.mxu1 %v3055_v21  ;;  %v436_v58 = vld [vmem:[#allocation7 + $0x160] sm:$0xff]  ;;  %v438_v61 = vld [vmem:[#allocation7 + $0x170] sm:$0xff]  ;;  %v3103_v63 = vpack.c.bf16 %v439_v54, %v435_v52  ;;  %v441_v1 = vld [vmem:[#allocation7 + $0x188] sm:$0xff] }
  0x67   :  { %1937 = vmatmul.mubr.msk.f32.gmra.mrb[4].mxu1 %vm141_vm0, %v81_v24  ;;  %2063 = vmatpush1.bf16.msra.mxu0 %v3059_v25  ;;  %v445_v3 = vld [vmem:[#allocation7 + $0x1a8] sm:$0xff]  ;;  %v3107_v6 = vpack.c.bf16 %v436_v58, %v432_v57  ;;  %v443_v7 = vld [vmem:[#allocation7 + $0x198] sm:$0xff]  ;;  %v3111_v10 = vpack.c.bf16 %v438_v61, %v434_v60  ;;  %v440_v11 = vld [vmem:[#allocation7 + $0x180] sm:$0xff]  ;;  %v123_v46 = vsub.s32 0, %v122_v45  ;;  %v127_v49 = vsub.s32 1, %v122_v45 }
  0x68   :  { %2095 = vmatpush1.bf16.msra.mxu1 %v3063_v28  ;;  %248 = vmatprep.mubr.f32.mxu0 %v2918_v0  ;;  %v84_v4 = vld [vmem:[#allocation2 + $0x28] sm:$0xff]  ;;  %v447_v9 = vld [vmem:[#allocation7 + $0x1b8] sm:$0xff]  ;;  %v444_v13 = vld [vmem:[#allocation7 + $0x1a0] sm:$0xff]  ;;  %v3115_v14 = vpack.c.bf16 %v445_v3, %v441_v1  ;;  %v135_v57 = vsub.s32 3, %v122_v45 }
  0x69   :  { %361 = vmatprep.mubr.f32.mxu1 %v2918_v0  ;;  %2065 = vmatprep.subr.bf16.mxu0 %v3067_v31  ;;  %v442_v16 = vld [vmem:[#allocation7 + $0x190] sm:$0xff]  ;;  %v3119_v19 = vpack.c.bf16 %v447_v9, %v443_v7  ;;  %v449_v20 = vld [vmem:[#allocation7 + $0x1c8] sm:$0xff]  ;;  %v3123_v24 = vpack.c.bf16 %v444_v13, %v440_v11  ;;  %v451_v26 = vld [vmem:[#allocation7 + $0x1d8] sm:$0xff]  ;;  %v131_v11 = vsub.s32 2, %v122_v45 }
  0x6a   :  { %1930 = vmatmul.mubr.msk.f32.gmra.mrb[6].mxu0 %vm141_vm0, %v82_v37  ;;  %2097 = vmatprep.subr.bf16.mxu1 %v3071_v34  ;;  %v446_v17 = vld [vmem:[#allocation7 + $0x1b0] sm:$0xff]  ;;  %v453_v22 = vld [vmem:[#allocation7 + $0x1e8] sm:$0xff]  ;;  %v455_v27 = vld [vmem:[#allocation7 + $0x1f8] sm:$0xff] }
  0x6b   :  { %1938 = vmatmul.mubr.msk.f32.gmra.mrb[6].mxu1 %vm141_vm0, %v82_v37  ;;  %2067 = vmatpush1.bf16.msra.mxu0 %v3075_v38  ;;  %v85_v23 = vld [vmem:[#allocation2 + $0x30] sm:$0xff]  ;;  %v3127_v29 = vpack.c.bf16 %v446_v17, %v442_v16  ;;  %v448_v30 = vld [vmem:[#allocation7 + $0x1c0] sm:$0xff]  ;;  %v3131_v33 = vpack.c.bf16 %v453_v22, %v449_v20  ;;  %v3135_v37 = vpack.c.bf16 %v455_v27, %v451_v26  ;;  %v86_v39 = vld [vmem:[#allocation2 + $0x38] sm:$0xff] }
  0x6c   :  { %2099 = vmatpush1.bf16.msra.mxu1 %v3079_v41  ;;  %254 = vmatprep.mubr.f32.mxu0 %v2918_v0  ;;  %v452_v32 = vld [vmem:[#allocation7 + $0x1e0] sm:$0xff]  ;;  %v450_v35 = vld [vmem:[#allocation7 + $0x1d0] sm:$0xff] }
  0x6d   :  { %367 = vmatprep.mubr.f32.mxu1 %v2918_v0  ;;  %2069 = vmatprep.subr.bf16.mxu0 %v3083_v44  ;;  %v454_v36 = vld [vmem:[#allocation7 + $0x1f0] sm:$0xff]  ;;  %v3139_v40 = vpack.c.bf16 %v452_v32, %v448_v30  ;;  %v119_v48 = vld [vmem:[%s3484_s3] sm:$0xf] }
  0x6e   :  { %1931 = vmatmul.mubr.msk.f32.gmra.mrb[8].mxu0 %vm141_vm0, %v83_v50  ;;  %2101 = vmatprep.subr.bf16.mxu1 %v3087_v47  ;;  %v3143_v42 = vpack.c.bf16 %v454_v36, %v450_v35  ;;  %v3197_v52 = vrot.slane %v119_v48, %v127_v49  ;;  %v3201_v9 = vrot.slane %v119_v48, %v135_v57 }
  0x6f   :  { %1939 = vmatmul.mubr.msk.f32.gmra.mrb[8].mxu1 %vm141_vm0, %v83_v50  ;;  %2071 = vmatpush1.bf16.msra.mxu0 %v3091_v51  ;;  %v3195_v50 = vrot.slane %v119_v48, %v123_v46  ;;  %v3204_v16 = vrot.slane %v119_v48, %v131_v11 }
  0x70   :  { %2103 = vmatpush1.bf16.msra.mxu1 %v3095_v55  ;;  %260 = vmatprep.mubr.f32.mxu0 %v2918_v0 }
  0x71   :  { %373 = vmatprep.mubr.f32.mxu1 %v2918_v0  ;;  %2073 = vmatprep.subr.bf16.mxu0 %v3099_v59 }
  0x72   :  { %1932 = vmatmul.mubr.msk.f32.gmra.mrb[10].mxu0 %vm141_vm0, %v84_v4  ;;  %2105 = vmatprep.subr.bf16.mxu1 %v3103_v63 }
  0x73   :  { %1940 = vmatmul.mubr.msk.f32.gmra.mrb[10].mxu1 %vm141_vm0, %v84_v4  ;;  %2075 = vmatpush1.bf16.msra.mxu0 %v3107_v6 }
  0x74   :  { %2107 = vmatpush1.bf16.msra.mxu1 %v3111_v10  ;;  %266 = vmatprep.mubr.f32.mxu0 %v2918_v0 }
  0x75   :  { %379 = vmatprep.mubr.f32.mxu1 %v2918_v0  ;;  %2077 = vmatprep.subr.bf16.mxu0 %v3115_v14 }
  0x76   :  { %1933 = vmatmul.mubr.msk.f32.gmra.mrb[12].mxu0 %vm141_vm0, %v85_v23  ;;  %2109 = vmatprep.subr.bf16.mxu1 %v3119_v19 }
  0x77   :  { %1941 = vmatmul.mubr.msk.f32.gmra.mrb[12].mxu1 %vm141_vm0, %v85_v23  ;;  %2079 = vmatpush1.bf16.msra.mxu0 %v3123_v24 }
  0x78   :  { %2111 = vmatpush1.bf16.msra.mxu1 %v3127_v29  ;;  %272 = vmatprep.mubr.f32.mxu0 %v2918_v0 }
  0x79   :  { %385 = vmatprep.mubr.f32.mxu1 %v2918_v0  ;;  %2081 = vmatprep.subr.bf16.mxu0 %v3131_v33 }
  0x7a   :  { %1934 = vmatmul.mubr.msk.f32.gmra.mrb[14].mxu0 %vm141_vm0, %v86_v39  ;;  %2113 = vmatprep.subr.bf16.mxu1 %v3135_v37 }
  0x7b   :  { %1942 = vmatmul.mubr.msk.f32.gmra.mrb[14].mxu1 %vm141_vm0, %v86_v39  ;;  %2083 = vmatpush1.bf16.msra.mxu0 %v3139_v40 }
  0x7c   :  { %2115 = vmatpush1.bf16.msra.mxu1 %v3143_v42  ;;  %520 = vmatprep.mubr.f32.mxu0 %v2918_v0 }
  0x7d   :  { %591 = vmatprep.mubr.f32.mxu1 %v2918_v0  ;;  %2117 = vmatprep.subr.bf16.mxu0 %v3026_v53 }
  0x7e   :  { %521 = vmatmul.mubr.f32.vlgmr.msra.gmra.mrb[0].mxu0 %v2918_v0  ;;  %2149 = vmatprep.subr.bf16.mxu1 %v3028_v56 }
  0x7f   :  { %592 = vmatmul.mubr.f32.vlgmr.msra.gmra.mrb[0].mxu1 %v2918_v0  ;;  %2119 = vmatpush1.bf16.msra.mxu0 %v3030_v62 }
  0x80   :  { %2151 = vmatpush1.bf16.msra.mxu1 %v3033_v2  ;;  %2121 = vmatprep.subr.bf16.mxu0 %v3036_v5 }
  0x81   :  { %2153 = vmatprep.subr.bf16.mxu1 %v3039_v8  ;;  %690 = vmatprep.mubr.f32.mxu0 %v2918_v0 }
  0x82   :  { %761 = vmatprep.mubr.f32.mxu1 %v2918_v0 }
  0x83   :  { %2123 = vmatpush1.bf16.msra.mxu0 %v3043_v12 }
  0x84   :  { %2155 = vmatpush1.bf16.msra.mxu1 %v3047_v15  ;;  %2125 = vmatprep.subr.bf16.mxu0 %v3051_v18 }
  0x85   :  { %2157 = vmatprep.subr.bf16.mxu1 %v3055_v21 }
  0x87   :  { %2127 = vmatpush1.bf16.msra.mxu0 %v3059_v25 }
  0x88   :  { %2159 = vmatpush1.bf16.msra.mxu1 %v3063_v28  ;;  %2129 = vmatprep.subr.bf16.mxu0 %v3067_v31 }
  0x89   :  { %2161 = vmatprep.subr.bf16.mxu1 %v3071_v34 }
  0x8b   :  { %2131 = vmatpush1.bf16.msra.mxu0 %v3075_v38 }
  0x8c   :  { %2163 = vmatpush1.bf16.msra.mxu1 %v3079_v41  ;;  %2133 = vmatprep.subr.bf16.mxu0 %v3083_v44 }
  0x8d   :  { %2165 = vmatprep.subr.bf16.mxu1 %v3087_v47 }
  0x8f   :  { %2135 = vmatpush1.bf16.msra.mxu0 %v3091_v51 }
  0x90   :  { %2167 = vmatpush1.bf16.msra.mxu1 %v3095_v55  ;;  %2137 = vmatprep.subr.bf16.mxu0 %v3099_v59 }
  0x91   :  { %2169 = vmatprep.subr.bf16.mxu1 %v3103_v63 }
  0x93   :  { %2139 = vmatpush1.bf16.msra.mxu0 %v3107_v6 }
  0x94   :  { %2171 = vmatpush1.bf16.msra.mxu1 %v3111_v10  ;;  %2141 = vmatprep.subr.bf16.mxu0 %v3115_v14 }
  0x95   :  { %2173 = vmatprep.subr.bf16.mxu1 %v3119_v19 }
  0x97   :  { %2143 = vmatpush1.bf16.msra.mxu0 %v3123_v24 }
  0x98   :  { %2175 = vmatpush1.bf16.msra.mxu1 %v3127_v29  ;;  %2145 = vmatprep.subr.bf16.mxu0 %v3131_v33 }
  0x99   :  { %2177 = vmatprep.subr.bf16.mxu1 %v3135_v37 }
  0x9b   :  { %2147 = vmatpush1.bf16.msra.mxu0 %v3139_v40 }
  0x9c   :  { %2179 = vmatpush1.bf16.msra.mxu1 %v3143_v42  ;;  %2181 = vmatprep.subr.bf16.mxu0 %v3026_v53 }
  0x9d   :  { %2213 = vmatprep.subr.bf16.mxu1 %v3028_v56 }
 0x151   :  { %v522_v54 = vpop.f32.mrb[0].mxu0 }
 0x152   :  { %v2588_v58 = vadd.f32 %v522_v54, %v3195_v50  ;;  %v593_v60 = vpop.f32.mrb[0].mxu1  ;;  %v524_v61 = vpop.f32.mrb[1].mxu0 }
 0x153   :  { %v2589_v1 = vadd.f32 %v524_v61, %v3197_v52  ;;  %v595_v3 = vpop.f32.mrb[1].mxu1  ;;  %v2604_v20 = vadd.f32 %v593_v60, %v3204_v16 }
 0x154   :  { %v1943_v4 = vmul.f32 -1.442695, %v2588_v58  ;;  %v2605_v13 = vadd.f32 %v595_v3, %v3201_v9 }
 0x155   :  { %v1944_v7 = vmul.f32 -1.442695, %v2589_v1 }
 0x156   :  { %2664 = vpow2.f32 %v1943_v4  ;;  %v1945_v17 = vmul.f32 -1.442695, %v2605_v13 }
 0x157   :  { %2666 = vpow2.f32 %v1944_v7 }
 0x158   :  { %2668 = vpow2.f32 %v1945_v17 }
 0x159   :  { %2670 = vtanh.f32 %v2604_v20 }
 0x160   :  { %v2665_v22 = vpop.eup %2664 }
 0x161   :  { %v2667_v23 = vpop.eup %2666  ;;  %v605_v26 = vadd.f32 1.0, %v2665_v22 }
 0x162   :  { %v611_v27 = vadd.f32 1.0, %v2667_v23  ;;  %v2669_v30 = vpop.eup %2668 }
 0x163   :  { %2672 = vrcp.f32 %v605_v26  ;;  %v2671_v32 = vpop.eup %2670  ;;  %v618_v43 = vadd.f32 1.0, %v2669_v30 }
 0x164   :  { %2674 = vrcp.f32 %v611_v27 }
 0x165   :  { %2676 = vrcp.f32 %v618_v43 }
 0x16d   :  { %v2673_v35 = vpop.eup %2672 }
 0x16e   :  { %v2675_v36 = vpop.eup %2674  ;;  %v622_v39 = vmul.f32 %v2673_v35, %v2671_v32 }
 0x16f   :  { %v621_v45 = vmul.f32 0.0, %v2675_v36  ;;  %v2677_v48 = vpop.eup %2676 }
 0x171   :  { %v3207_v46 = vadd.f32 %v622_v39, %v621_v45 }
 0x173   :  { %2678 = vtanh.f32 %v3207_v46 }
 0x17d   :  { %v2679_v49 = vpop.eup %2678 }
 0x17e   :  { %v625_v54 = vmul.f32 %v2679_v49, %v2677_v48 }
 0x180   :  { %691 = vmatmul.mubr.f32.vlgmr.msra.gmra.mrb[2].mxu0 %v625_v54  ;;  %762 = vmatmul.mubr.f32.vlgmr.msra.gmra.mrb[2].mxu1 %v625_v54 }
 0x181   :  { %2183 = vmatpush1.bf16.msra.mxu0 %v3030_v62  ;;  %2215 = vmatpush1.bf16.msra.mxu1 %v3033_v2 }
 0x182   :  { %2185 = vmatprep.subr.bf16.mxu0 %v3036_v5  ;;  %2217 = vmatprep.subr.bf16.mxu1 %v3039_v8 }
 0x183   :  { %860 = vmatprep.mubr.f32.mxu0 %v2918_v0  ;;  %931 = vmatprep.mubr.f32.mxu1 %v2918_v0 }
 0x185   :  { %2187 = vmatpush1.bf16.msra.mxu0 %v3043_v12  ;;  %2219 = vmatpush1.bf16.msra.mxu1 %v3047_v15 }
 0x186   :  { %2189 = vmatprep.subr.bf16.mxu0 %v3051_v18  ;;  %2221 = vmatprep.subr.bf16.mxu1 %v3055_v21 }
 0x189   :  { %2191 = vmatpush1.bf16.msra.mxu0 %v3059_v25  ;;  %2223 = vmatpush1.bf16.msra.mxu1 %v3063_v28 }
 0x18a   :  { %2193 = vmatprep.subr.bf16.mxu0 %v3067_v31  ;;  %2225 = vmatprep.subr.bf16.mxu1 %v3071_v34 }
 0x18d   :  { %2195 = vmatpush1.bf16.msra.mxu0 %v3075_v38  ;;  %2227 = vmatpush1.bf16.msra.mxu1 %v3079_v41 }
 0x18e   :  { %2197 = vmatprep.subr.bf16.mxu0 %v3083_v44  ;;  %2229 = vmatprep.subr.bf16.mxu1 %v3087_v47 }
 0x191   :  { %2199 = vmatpush1.bf16.msra.mxu0 %v3091_v51  ;;  %2231 = vmatpush1.bf16.msra.mxu1 %v3095_v55 }
 0x192   :  { %2201 = vmatprep.subr.bf16.mxu0 %v3099_v59  ;;  %2233 = vmatprep.subr.bf16.mxu1 %v3103_v63 }
 0x195   :  { %2203 = vmatpush1.bf16.msra.mxu0 %v3107_v6  ;;  %2235 = vmatpush1.bf16.msra.mxu1 %v3111_v10 }
 0x196   :  { %2205 = vmatprep.subr.bf16.mxu0 %v3115_v14  ;;  %2237 = vmatprep.subr.bf16.mxu1 %v3119_v19 }
 0x199   :  { %2207 = vmatpush1.bf16.msra.mxu0 %v3123_v24  ;;  %2239 = vmatpush1.bf16.msra.mxu1 %v3127_v29 }
 0x19a   :  { %2209 = vmatprep.subr.bf16.mxu0 %v3131_v33  ;;  %2241 = vmatprep.subr.bf16.mxu1 %v3135_v37 }
 0x19d   :  { %2211 = vmatpush1.bf16.msra.mxu0 %v3139_v40  ;;  %2243 = vmatpush1.bf16.msra.mxu1 %v3143_v42 }
 0x19e   :  { %2245 = vmatprep.subr.bf16.mxu0 %v3026_v53  ;;  %2277 = vmatprep.subr.bf16.mxu1 %v3028_v56 }
 0x253   :  { %v692_v57 = vpop.f32.mrb[2].mxu0  ;;  %v763_v58 = vpop.f32.mrb[2].mxu1 }
 0x254   :  { %v2590_v60 = vadd.f32 %v692_v57, %v3195_v50  ;;  %v694_v61 = vpop.f32.mrb[3].mxu0  ;;  %v765_v1 = vpop.f32.mrb[3].mxu1  ;;  %v2606_v17 = vadd.f32 %v763_v58, %v3204_v16 }
 0x255   :  { %v2591_v3 = vadd.f32 %v694_v61, %v3197_v52  ;;  %v2607_v11 = vadd.f32 %v765_v1, %v3201_v9 }
 0x256   :  { %v1946_v4 = vmul.f32 -1.442695, %v2590_v60 }
 0x257   :  { %v1947_v7 = vmul.f32 -1.442695, %v2591_v3  ;;  %v1948_v13 = vmul.f32 -1.442695, %v2607_v11 }
 0x258   :  { %2680 = vpow2.f32 %v1946_v4 }
 0x259   :  { %2682 = vpow2.f32 %v1947_v7 }
 0x25a   :  { %2684 = vpow2.f32 %v1948_v13 }
 0x25b   :  { %2686 = vtanh.f32 %v2606_v17 }
 0x262   :  { %v2681_v20 = vpop.eup %2680 }
 0x263   :  { %v2683_v22 = vpop.eup %2682  ;;  %v775_v23 = vadd.f32 1.0, %v2681_v20 }
 0x264   :  { %v781_v26 = vadd.f32 1.0, %v2683_v22  ;;  %v2685_v27 = vpop.eup %2684 }
 0x265   :  { %2688 = vrcp.f32 %v775_v23  ;;  %v2687_v30 = vpop.eup %2686  ;;  %v788_v39 = vadd.f32 1.0, %v2685_v27 }
 0x266   :  { %2690 = vrcp.f32 %v781_v26 }
 0x267   :  { %2692 = vrcp.f32 %v788_v39 }
 0x26f   :  { %v2689_v32 = vpop.eup %2688 }
 0x270   :  { %v2691_v35 = vpop.eup %2690  ;;  %v792_v36 = vmul.f32 %v2689_v32, %v2687_v30 }
 0x271   :  { %v791_v43 = vmul.f32 %v2691_v35, %v3207_v46  ;;  %v2693_v48 = vpop.eup %2692 }
 0x273   :  { %v3249_v45 = vadd.f32 %v792_v36, %v791_v43 }
 0x275   :  { %2694 = vtanh.f32 %v3249_v45 }
 0x27f   :  { %v2695_v49 = vpop.eup %2694 }
 0x280   :  { %v795_v54 = vmul.f32 %v2695_v49, %v2693_v48 }
 0x282   :  { %861 = vmatmul.mubr.f32.vlgmr.msra.gmra.mrb[4].mxu0 %v795_v54  ;;  %932 = vmatmul.mubr.f32.vlgmr.msra.gmra.mrb[4].mxu1 %v795_v54 }
 0x283   :  { %2247 = vmatpush1.bf16.msra.mxu0 %v3030_v62  ;;  %2279 = vmatpush1.bf16.msra.mxu1 %v3033_v2 }
 0x284   :  { %2249 = vmatprep.subr.bf16.mxu0 %v3036_v5  ;;  %2281 = vmatprep.subr.bf16.mxu1 %v3039_v8 }
 0x285   :  { %1030 = vmatprep.mubr.f32.mxu0 %v2918_v0  ;;  %1101 = vmatprep.mubr.f32.mxu1 %v2918_v0 }
 0x287   :  { %2251 = vmatpush1.bf16.msra.mxu0 %v3043_v12  ;;  %2283 = vmatpush1.bf16.msra.mxu1 %v3047_v15 }
 0x288   :  { %2253 = vmatprep.subr.bf16.mxu0 %v3051_v18  ;;  %2285 = vmatprep.subr.bf16.mxu1 %v3055_v21 }
 0x28b   :  { %2255 = vmatpush1.bf16.msra.mxu0 %v3059_v25  ;;  %2287 = vmatpush1.bf16.msra.mxu1 %v3063_v28 }
 0x28c   :  { %2257 = vmatprep.subr.bf16.mxu0 %v3067_v31  ;;  %2289 = vmatprep.subr.bf16.mxu1 %v3071_v34 }
 0x28f   :  { %2259 = vmatpush1.bf16.msra.mxu0 %v3075_v38  ;;  %2291 = vmatpush1.bf16.msra.mxu1 %v3079_v41 }
 0x290   :  { %2261 = vmatprep.subr.bf16.mxu0 %v3083_v44  ;;  %2293 = vmatprep.subr.bf16.mxu1 %v3087_v47 }
 0x293   :  { %2263 = vmatpush1.bf16.msra.mxu0 %v3091_v51  ;;  %2295 = vmatpush1.bf16.msra.mxu1 %v3095_v55 }
 0x294   :  { %2265 = vmatprep.subr.bf16.mxu0 %v3099_v59  ;;  %2297 = vmatprep.subr.bf16.mxu1 %v3103_v63 }
 0x297   :  { %2267 = vmatpush1.bf16.msra.mxu0 %v3107_v6  ;;  %2299 = vmatpush1.bf16.msra.mxu1 %v3111_v10 }
 0x298   :  { %2269 = vmatprep.subr.bf16.mxu0 %v3115_v14  ;;  %2301 = vmatprep.subr.bf16.mxu1 %v3119_v19 }
 0x29b   :  { %2271 = vmatpush1.bf16.msra.mxu0 %v3123_v24  ;;  %2303 = vmatpush1.bf16.msra.mxu1 %v3127_v29 }
 0x29c   :  { %2273 = vmatprep.subr.bf16.mxu0 %v3131_v33  ;;  %2305 = vmatprep.subr.bf16.mxu1 %v3135_v37 }
 0x29f   :  { %2275 = vmatpush1.bf16.msra.mxu0 %v3139_v40  ;;  %2307 = vmatpush1.bf16.msra.mxu1 %v3143_v42 }
 0x2a0   :  { %2309 = vmatprep.subr.bf16.mxu0 %v3026_v53  ;;  %2341 = vmatprep.subr.bf16.mxu1 %v3028_v56 }
 0x355   :  { %v862_v46 = vpop.f32.mrb[4].mxu0  ;;  %v933_v57 = vpop.f32.mrb[4].mxu1 }
 0x356   :  { %v2592_v58 = vadd.f32 %v862_v46, %v3195_v50  ;;  %v864_v60 = vpop.f32.mrb[5].mxu0  ;;  %v935_v61 = vpop.f32.mrb[5].mxu1  ;;  %v2608_v13 = vadd.f32 %v933_v57, %v3204_v16 }
 0x357   :  { %v2593_v1 = vadd.f32 %v864_v60, %v3197_v52  ;;  %v2609_v7 = vadd.f32 %v935_v61, %v3201_v9 }
 0x358   :  { %v1949_v3 = vmul.f32 -1.442695, %v2592_v58 }
 0x359   :  { %v1950_v4 = vmul.f32 -1.442695, %v2593_v1  ;;  %v1951_v11 = vmul.f32 -1.442695, %v2609_v7 }
 0x35a   :  { %2696 = vpow2.f32 %v1949_v3 }
 0x35b   :  { %2698 = vpow2.f32 %v1950_v4 }
 0x35c   :  { %2700 = vpow2.f32 %v1951_v11 }
 0x35d   :  { %2702 = vtanh.f32 %v2608_v13 }
 0x364   :  { %v2697_v17 = vpop.eup %2696 }
 0x365   :  { %v2699_v20 = vpop.eup %2698  ;;  %v945_v22 = vadd.f32 1.0, %v2697_v17 }
 0x366   :  { %v951_v23 = vadd.f32 1.0, %v2699_v20  ;;  %v2701_v26 = vpop.eup %2700 }
 0x367   :  { %2704 = vrcp.f32 %v945_v22  ;;  %v2703_v27 = vpop.eup %2702  ;;  %v958_v36 = vadd.f32 1.0, %v2701_v26 }
 0x368   :  { %2706 = vrcp.f32 %v951_v23 }
 0x369   :  { %2708 = vrcp.f32 %v958_v36 }
 0x371   :  { %v2705_v30 = vpop.eup %2704 }
 0x372   :  { %v2707_v32 = vpop.eup %2706  ;;  %v962_v35 = vmul.f32 %v2705_v30, %v2703_v27 }
 0x373   :  { %v961_v39 = vmul.f32 %v2707_v32, %v3249_v45  ;;  %v2709_v48 = vpop.eup %2708 }
 0x375   :  { %v3291_v43 = vadd.f32 %v962_v35, %v961_v39 }
 0x377   :  { %2710 = vtanh.f32 %v3291_v43 }
 0x381   :  { %v2711_v49 = vpop.eup %2710 }
 0x382   :  { %v965_v54 = vmul.f32 %v2711_v49, %v2709_v48 }
 0x384   :  { %1031 = vmatmul.mubr.f32.vlgmr.msra.gmra.mrb[6].mxu0 %v965_v54  ;;  %1102 = vmatmul.mubr.f32.vlgmr.msra.gmra.mrb[6].mxu1 %v965_v54 }
 0x385   :  { %2311 = vmatpush1.bf16.msra.mxu0 %v3030_v62  ;;  %2343 = vmatpush1.bf16.msra.mxu1 %v3033_v2 }
 0x386   :  { %2313 = vmatprep.subr.bf16.mxu0 %v3036_v5  ;;  %2345 = vmatprep.subr.bf16.mxu1 %v3039_v8 }
 0x387   :  { %1200 = vmatprep.mubr.f32.mxu0 %v2918_v0  ;;  %1271 = vmatprep.mubr.f32.mxu1 %v2918_v0 }
 0x389   :  { %2315 = vmatpush1.bf16.msra.mxu0 %v3043_v12  ;;  %2347 = vmatpush1.bf16.msra.mxu1 %v3047_v15 }
 0x38a   :  { %2317 = vmatprep.subr.bf16.mxu0 %v3051_v18  ;;  %2349 = vmatprep.subr.bf16.mxu1 %v3055_v21 }
 0x38d   :  { %2319 = vmatpush1.bf16.msra.mxu0 %v3059_v25  ;;  %2351 = vmatpush1.bf16.msra.mxu1 %v3063_v28 }
 0x38e   :  { %2321 = vmatprep.subr.bf16.mxu0 %v3067_v31  ;;  %2353 = vmatprep.subr.bf16.mxu1 %v3071_v34 }
 0x391   :  { %2323 = vmatpush1.bf16.msra.mxu0 %v3075_v38  ;;  %2355 = vmatpush1.bf16.msra.mxu1 %v3079_v41 }
 0x392   :  { %2325 = vmatprep.subr.bf16.mxu0 %v3083_v44  ;;  %2357 = vmatprep.subr.bf16.mxu1 %v3087_v47 }
 0x395   :  { %2327 = vmatpush1.bf16.msra.mxu0 %v3091_v51  ;;  %2359 = vmatpush1.bf16.msra.mxu1 %v3095_v55 }
 0x396   :  { %2329 = vmatprep.subr.bf16.mxu0 %v3099_v59  ;;  %2361 = vmatprep.subr.bf16.mxu1 %v3103_v63 }
 0x399   :  { %2331 = vmatpush1.bf16.msra.mxu0 %v3107_v6  ;;  %2363 = vmatpush1.bf16.msra.mxu1 %v3111_v10 }
 0x39a   :  { %2333 = vmatprep.subr.bf16.mxu0 %v3115_v14  ;;  %2365 = vmatprep.subr.bf16.mxu1 %v3119_v19 }
 0x39d   :  { %2335 = vmatpush1.bf16.msra.mxu0 %v3123_v24  ;;  %2367 = vmatpush1.bf16.msra.mxu1 %v3127_v29 }
 0x39e   :  { %2337 = vmatprep.subr.bf16.mxu0 %v3131_v33  ;;  %2369 = vmatprep.subr.bf16.mxu1 %v3135_v37 }
 0x3a1   :  { %2339 = vmatpush1.bf16.msra.mxu0 %v3139_v40  ;;  %2371 = vmatpush1.bf16.msra.mxu1 %v3143_v42 }
 0x3a2   :  { %2373 = vmatprep.subr.bf16.mxu0 %v3026_v53  ;;  %2405 = vmatprep.subr.bf16.mxu1 %v3028_v56 }
 0x457   :  { %v1032_v45 = vpop.f32.mrb[6].mxu0  ;;  %v1103_v46 = vpop.f32.mrb[6].mxu1 }
 0x458   :  { %v2594_v57 = vadd.f32 %v1032_v45, %v3195_v50  ;;  %v1034_v58 = vpop.f32.mrb[7].mxu0  ;;  %v1105_v60 = vpop.f32.mrb[7].mxu1  ;;  %v2610_v11 = vadd.f32 %v1103_v46, %v3204_v16 }
 0x459   :  { %v2595_v61 = vadd.f32 %v1034_v58, %v3197_v52  ;;  %v2611_v4 = vadd.f32 %v1105_v60, %v3201_v9 }
 0x45a   :  { %v1952_v1 = vmul.f32 -1.442695, %v2594_v57 }
 0x45b   :  { %v1953_v3 = vmul.f32 -1.442695, %v2595_v61  ;;  %v1954_v7 = vmul.f32 -1.442695, %v2611_v4 }
 0x45c   :  { %2712 = vpow2.f32 %v1952_v1 }
 0x45d   :  { %2714 = vpow2.f32 %v1953_v3 }
 0x45e   :  { %2716 = vpow2.f32 %v1954_v7 }
 0x45f   :  { %2718 = vtanh.f32 %v2610_v11 }
 0x466   :  { %v2713_v13 = vpop.eup %2712 }
 0x467   :  { %v2715_v17 = vpop.eup %2714  ;;  %v1115_v20 = vadd.f32 1.0, %v2713_v13 }
 0x468   :  { %v1121_v22 = vadd.f32 1.0, %v2715_v17  ;;  %v2717_v23 = vpop.eup %2716 }
 0x469   :  { %2720 = vrcp.f32 %v1115_v20  ;;  %v2719_v26 = vpop.eup %2718  ;;  %v1128_v35 = vadd.f32 1.0, %v2717_v23 }
 0x46a   :  { %2722 = vrcp.f32 %v1121_v22 }
 0x46b   :  { %2724 = vrcp.f32 %v1128_v35 }
 0x473   :  { %v2721_v27 = vpop.eup %2720 }
 0x474   :  { %v2723_v30 = vpop.eup %2722  ;;  %v1132_v32 = vmul.f32 %v2721_v27, %v2719_v26 }
 0x475   :  { %v1131_v36 = vmul.f32 %v2723_v30, %v3291_v43  ;;  %v2725_v48 = vpop.eup %2724 }
 0x477   :  { %v3333_v39 = vadd.f32 %v1132_v32, %v1131_v36 }
 0x479   :  { %2726 = vtanh.f32 %v3333_v39 }
 0x483   :  { %v2727_v49 = vpop.eup %2726 }
 0x484   :  { %v1135_v54 = vmul.f32 %v2727_v49, %v2725_v48 }
 0x486   :  { %1201 = vmatmul.mubr.f32.vlgmr.msra.gmra.mrb[8].mxu0 %v1135_v54  ;;  %1272 = vmatmul.mubr.f32.vlgmr.msra.gmra.mrb[8].mxu1 %v1135_v54 }
 0x487   :  { %2375 = vmatpush1.bf16.msra.mxu0 %v3030_v62  ;;  %2407 = vmatpush1.bf16.msra.mxu1 %v3033_v2 }
 0x488   :  { %2377 = vmatprep.subr.bf16.mxu0 %v3036_v5  ;;  %2409 = vmatprep.subr.bf16.mxu1 %v3039_v8 }
 0x489   :  { %1370 = vmatprep.mubr.f32.mxu0 %v2918_v0  ;;  %1441 = vmatprep.mubr.f32.mxu1 %v2918_v0 }
 0x48b   :  { %2379 = vmatpush1.bf16.msra.mxu0 %v3043_v12  ;;  %2411 = vmatpush1.bf16.msra.mxu1 %v3047_v15 }
 0x48c   :  { %2381 = vmatprep.subr.bf16.mxu0 %v3051_v18  ;;  %2413 = vmatprep.subr.bf16.mxu1 %v3055_v21 }
 0x48f   :  { %2383 = vmatpush1.bf16.msra.mxu0 %v3059_v25  ;;  %2415 = vmatpush1.bf16.msra.mxu1 %v3063_v28 }
 0x490   :  { %2385 = vmatprep.subr.bf16.mxu0 %v3067_v31  ;;  %2417 = vmatprep.subr.bf16.mxu1 %v3071_v34 }
 0x493   :  { %2387 = vmatpush1.bf16.msra.mxu0 %v3075_v38  ;;  %2419 = vmatpush1.bf16.msra.mxu1 %v3079_v41 }
 0x494   :  { %2389 = vmatprep.subr.bf16.mxu0 %v3083_v44  ;;  %2421 = vmatprep.subr.bf16.mxu1 %v3087_v47 }
 0x497   :  { %2391 = vmatpush1.bf16.msra.mxu0 %v3091_v51  ;;  %2423 = vmatpush1.bf16.msra.mxu1 %v3095_v55 }
 0x498   :  { %2393 = vmatprep.subr.bf16.mxu0 %v3099_v59  ;;  %2425 = vmatprep.subr.bf16.mxu1 %v3103_v63 }
 0x49b   :  { %2395 = vmatpush1.bf16.msra.mxu0 %v3107_v6  ;;  %2427 = vmatpush1.bf16.msra.mxu1 %v3111_v10 }
 0x49c   :  { %2397 = vmatprep.subr.bf16.mxu0 %v3115_v14  ;;  %2429 = vmatprep.subr.bf16.mxu1 %v3119_v19 }
 0x49f   :  { %2399 = vmatpush1.bf16.msra.mxu0 %v3123_v24  ;;  %2431 = vmatpush1.bf16.msra.mxu1 %v3127_v29 }
 0x4a0   :  { %2401 = vmatprep.subr.bf16.mxu0 %v3131_v33  ;;  %2433 = vmatprep.subr.bf16.mxu1 %v3135_v37 }
 0x4a3   :  { %2403 = vmatpush1.bf16.msra.mxu0 %v3139_v40  ;;  %2435 = vmatpush1.bf16.msra.mxu1 %v3143_v42 }
 0x4a4   :  { %2437 = vmatprep.subr.bf16.mxu0 %v3026_v53  ;;  %2469 = vmatprep.subr.bf16.mxu1 %v3028_v56 }
 0x559   :  { %v1202_v43 = vpop.f32.mrb[8].mxu0  ;;  %v1273_v45 = vpop.f32.mrb[8].mxu1 }
 0x55a   :  { %v2596_v46 = vadd.f32 %v1202_v43, %v3195_v50  ;;  %v1204_v57 = vpop.f32.mrb[9].mxu0  ;;  %v1275_v58 = vpop.f32.mrb[9].mxu1  ;;  %v2612_v7 = vadd.f32 %v1273_v45, %v3204_v16 }
 0x55b   :  { %v2597_v60 = vadd.f32 %v1204_v57, %v3197_v52  ;;  %v2613_v3 = vadd.f32 %v1275_v58, %v3201_v9 }
 0x55c   :  { %v1955_v61 = vmul.f32 -1.442695, %v2596_v46 }
 0x55d   :  { %v1956_v1 = vmul.f32 -1.442695, %v2597_v60  ;;  %v1957_v4 = vmul.f32 -1.442695, %v2613_v3 }
 0x55e   :  { %2728 = vpow2.f32 %v1955_v61 }
 0x55f   :  { %2730 = vpow2.f32 %v1956_v1 }
 0x560   :  { %2732 = vpow2.f32 %v1957_v4 }
 0x561   :  { %2734 = vtanh.f32 %v2612_v7 }
 0x568   :  { %v2729_v11 = vpop.eup %2728 }
 0x569   :  { %v2731_v13 = vpop.eup %2730  ;;  %v1285_v17 = vadd.f32 1.0, %v2729_v11 }
 0x56a   :  { %v1291_v20 = vadd.f32 1.0, %v2731_v13  ;;  %v2733_v22 = vpop.eup %2732 }
 0x56b   :  { %2736 = vrcp.f32 %v1285_v17  ;;  %v2735_v23 = vpop.eup %2734  ;;  %v1298_v32 = vadd.f32 1.0, %v2733_v22 }
 0x56c   :  { %2738 = vrcp.f32 %v1291_v20 }
 0x56d   :  { %2740 = vrcp.f32 %v1298_v32 }
 0x575   :  { %v2737_v26 = vpop.eup %2736 }
 0x576   :  { %v2739_v27 = vpop.eup %2738  ;;  %v1302_v30 = vmul.f32 %v2737_v26, %v2735_v23 }
 0x577   :  { %v1301_v35 = vmul.f32 %v2739_v27, %v3333_v39  ;;  %v2741_v48 = vpop.eup %2740 }
 0x579   :  { %v3375_v36 = vadd.f32 %v1302_v30, %v1301_v35 }
 0x57b   :  { %2742 = vtanh.f32 %v3375_v36 }
 0x585   :  { %v2743_v49 = vpop.eup %2742 }
 0x586   :  { %v1305_v54 = vmul.f32 %v2743_v49, %v2741_v48  ;;  %v1819_v49 = vld [vmem:[#allocation8 + $0x18] sm:$0xff] }
 0x588   :  { %1371 = vmatmul.mubr.f32.vlgmr.msra.gmra.mrb[10].mxu0 %v1305_v54  ;;  %1442 = vmatmul.mubr.f32.vlgmr.msra.gmra.mrb[10].mxu1 %v1305_v54 }
 0x589   :  { %2439 = vmatpush1.bf16.msra.mxu0 %v3030_v62  ;;  %2471 = vmatpush1.bf16.msra.mxu1 %v3033_v2 }
 0x58a   :  { %2441 = vmatprep.subr.bf16.mxu0 %v3036_v5  ;;  %2473 = vmatprep.subr.bf16.mxu1 %v3039_v8 }
 0x58b   :  { %1540 = vmatprep.mubr.f32.mxu0 %v2918_v0  ;;  %1611 = vmatprep.mubr.f32.mxu1 %v2918_v0 }
 0x58d   :  { %2443 = vmatpush1.bf16.msra.mxu0 %v3043_v12  ;;  %2475 = vmatpush1.bf16.msra.mxu1 %v3047_v15 }
 0x58e   :  { %2445 = vmatprep.subr.bf16.mxu0 %v3051_v18  ;;  %2477 = vmatprep.subr.bf16.mxu1 %v3055_v21 }
 0x591   :  { %2447 = vmatpush1.bf16.msra.mxu0 %v3059_v25  ;;  %2479 = vmatpush1.bf16.msra.mxu1 %v3063_v28 }
 0x592   :  { %2449 = vmatprep.subr.bf16.mxu0 %v3067_v31  ;;  %2481 = vmatprep.subr.bf16.mxu1 %v3071_v34 }
 0x595   :  { %2451 = vmatpush1.bf16.msra.mxu0 %v3075_v38  ;;  %2483 = vmatpush1.bf16.msra.mxu1 %v3079_v41 }
 0x596   :  { %2453 = vmatprep.subr.bf16.mxu0 %v3083_v44  ;;  %2485 = vmatprep.subr.bf16.mxu1 %v3087_v47 }
 0x599   :  { %2455 = vmatpush1.bf16.msra.mxu0 %v3091_v51  ;;  %2487 = vmatpush1.bf16.msra.mxu1 %v3095_v55 }
 0x59a   :  { %2457 = vmatprep.subr.bf16.mxu0 %v3099_v59  ;;  %2489 = vmatprep.subr.bf16.mxu1 %v3103_v63 }
 0x59d   :  { %2459 = vmatpush1.bf16.msra.mxu0 %v3107_v6  ;;  %2491 = vmatpush1.bf16.msra.mxu1 %v3111_v10 }
 0x59e   :  { %2461 = vmatprep.subr.bf16.mxu0 %v3115_v14  ;;  %2493 = vmatprep.subr.bf16.mxu1 %v3119_v19 }
 0x5a1   :  { %2463 = vmatpush1.bf16.msra.mxu0 %v3123_v24  ;;  %2495 = vmatpush1.bf16.msra.mxu1 %v3127_v29 }
 0x5a2   :  { %2465 = vmatprep.subr.bf16.mxu0 %v3131_v33  ;;  %2497 = vmatprep.subr.bf16.mxu1 %v3135_v37 }
 0x5a5   :  { %2467 = vmatpush1.bf16.msra.mxu0 %v3139_v40  ;;  %2499 = vmatpush1.bf16.msra.mxu1 %v3143_v42 }
 0x5a6   :  { %2501 = vmatprep.subr.bf16.mxu0 %v3026_v53  ;;  %2533 = vmatprep.subr.bf16.mxu1 %v3028_v56 }
 0x65b   :  { %v1372_v39 = vpop.f32.mrb[10].mxu0  ;;  %v1443_v43 = vpop.f32.mrb[10].mxu1 }
 0x65c   :  { %v2598_v45 = vadd.f32 %v1372_v39, %v3195_v50  ;;  %v1374_v46 = vpop.f32.mrb[11].mxu0  ;;  %v1445_v57 = vpop.f32.mrb[11].mxu1  ;;  %v2614_v4 = vadd.f32 %v1443_v43, %v3204_v16  ;;  %v1820_v39 = vld [vmem:[#allocation8 + $0x20] sm:$0xff]  ;;  %v1821_v43 = vld [vmem:[#allocation8 + $0x28] sm:$0xff] }
 0x65d   :  { %v2599_v58 = vadd.f32 %v1374_v46, %v3197_v52  ;;  %v2615_v1 = vadd.f32 %v1445_v57, %v3201_v9  ;;  %v1822_v46 = vld [vmem:[#allocation8 + $0x30] sm:$0xff]  ;;  %v1823_v57 = vld [vmem:[#allocation8 + $0x38] sm:$0xff] }
 0x65e   :  { %v1958_v60 = vmul.f32 -1.442695, %v2598_v45  ;;  %v2571_v45 = vpack.c.bf16 %v1821_v43, %v1820_v39 }
 0x65f   :  { %v1959_v61 = vmul.f32 -1.442695, %v2599_v58  ;;  %v1960_v3 = vmul.f32 -1.442695, %v2615_v1  ;;  %v2574_v58 = vpack.c.bf16 %v1823_v57, %v1822_v46 }
 0x660   :  { %2744 = vpow2.f32 %v1958_v60  ;;  %v1824_v60 = vld [vmem:[#allocation8 + $0x40] sm:$0xff] }
 0x661   :  { %2746 = vpow2.f32 %v1959_v61  ;;  %v1825_v61 = vld [vmem:[#allocation8 + $0x48] sm:$0xff] }
 0x662   :  { %2748 = vpow2.f32 %v1960_v3  ;;  %v2577_v1 = vpack.c.bf16 %v1825_v61, %v1824_v60  ;;  %v1826_v3 = vld [vmem:[#allocation8 + $0x50] sm:$0xff] }
 0x663   :  { %2750 = vtanh.f32 %v2614_v4  ;;  %v1827_v4 = vld [vmem:[#allocation8 + $0x58] sm:$0xff] }
 0x66a   :  { %v2745_v53 = vpop.eup %2744 }
 0x66b   :  { %v2747_v7 = vpop.eup %2746  ;;  %v1455_v56 = vadd.f32 1.0, %v2745_v53  ;;  %v1828_v53 = vld [vmem:[#allocation8 + $0x60] sm:$0xff] }
 0x66c   :  { %v1461_v11 = vadd.f32 1.0, %v2747_v7  ;;  %v2749_v13 = vpop.eup %2748  ;;  %v2580_v7 = vpack.c.bf16 %v1827_v4, %v1826_v3 }
 0x66d   :  { %2752 = vrcp.f32 %v1455_v56  ;;  %v2751_v17 = vpop.eup %2750  ;;  %v1468_v26 = vadd.f32 1.0, %v2749_v13  ;;  %v1829_v56 = vld [vmem:[#allocation8 + $0x68] sm:$0xff]  ;;  %v1830_v13 = vld [vmem:[#allocation8 + $0x70] sm:$0xff] }
 0x66e   :  { %2754 = vrcp.f32 %v1461_v11  ;;  %v2583_v11 = vpack.c.bf16 %v1829_v56, %v1828_v53 }
 0x66f   :  { %2756 = vrcp.f32 %v1468_v26 }
 0x677   :  { %v2753_v20 = vpop.eup %2752 }
 0x678   :  { %v2755_v22 = vpop.eup %2754  ;;  %v1472_v23 = vmul.f32 %v2753_v20, %v2751_v17  ;;  %v1831_v17 = vld [vmem:[#allocation8 + $0x78] sm:$0xff] }
 0x679   :  { %v1471_v27 = vmul.f32 %v2755_v22, %v3375_v36  ;;  %v2757_v32 = vpop.eup %2756  ;;  %v1818_v36 = vld [vmem:[#allocation8 + $0x10] sm:$0xff]  ;;  %v2586_v20 = vpack.c.bf16 %v1831_v17, %v1830_v13 }
 0x67a   :  { %v2568_v54 = vpack.c.bf16 %v1819_v49, %v1818_v36 }
 0x67b   :  { %v3417_v30 = vadd.f32 %v1472_v23, %v1471_v27 }
 0x67d   :  { %2758 = vtanh.f32 %v3417_v30 }
 0x687   :  { %v2759_v35 = vpop.eup %2758 }
 0x688   :  { %v1475_v48 = vmul.f32 %v2759_v35, %v2757_v32 }
 0x68a   :  { %1541 = vmatmul.mubr.f32.vlgmr.msra.gmra.mrb[12].mxu0 %v1475_v48  ;;  %1612 = vmatmul.mubr.f32.vlgmr.msra.gmra.mrb[12].mxu1 %v1475_v48 }
 0x68b   :  { %2503 = vmatpush1.bf16.msra.mxu0 %v3030_v62  ;;  %2535 = vmatpush1.bf16.msra.mxu1 %v3033_v2 }
 0x68c   :  { %2505 = vmatprep.subr.bf16.mxu0 %v3036_v5  ;;  %2537 = vmatprep.subr.bf16.mxu1 %v3039_v8 }
 0x68d   :  { %1710 = vmatprep.mubr.f32.mxu0 %v2918_v0  ;;  %1781 = vmatprep.mubr.f32.mxu1 %v2918_v0 }
 0x68f   :  { %2507 = vmatpush1.bf16.msra.mxu0 %v3043_v12  ;;  %2539 = vmatpush1.bf16.msra.mxu1 %v3047_v15 }
 0x690   :  { %2509 = vmatprep.subr.bf16.mxu0 %v3051_v18  ;;  %2541 = vmatprep.subr.bf16.mxu1 %v3055_v21 }
 0x693   :  { %2511 = vmatpush1.bf16.msra.mxu0 %v3059_v25  ;;  %2543 = vmatpush1.bf16.msra.mxu1 %v3063_v28 }
 0x694   :  { %2513 = vmatprep.subr.bf16.mxu0 %v3067_v31  ;;  %2545 = vmatprep.subr.bf16.mxu1 %v3071_v34 }
 0x697   :  { %2515 = vmatpush1.bf16.msra.mxu0 %v3075_v38  ;;  %2547 = vmatpush1.bf16.msra.mxu1 %v3079_v41 }
 0x698   :  { %2517 = vmatprep.subr.bf16.mxu0 %v3083_v44  ;;  %2549 = vmatprep.subr.bf16.mxu1 %v3087_v47 }
 0x69b   :  { %2519 = vmatpush1.bf16.msra.mxu0 %v3091_v51  ;;  %2551 = vmatpush1.bf16.msra.mxu1 %v3095_v55 }
 0x69c   :  { %2521 = vmatprep.subr.bf16.mxu0 %v3099_v59  ;;  %2553 = vmatprep.subr.bf16.mxu1 %v3103_v63 }
 0x69f   :  { %2523 = vmatpush1.bf16.msra.mxu0 %v3107_v6  ;;  %2555 = vmatpush1.bf16.msra.mxu1 %v3111_v10 }
 0x6a0   :  { %2525 = vmatprep.subr.bf16.mxu0 %v3115_v14  ;;  %2557 = vmatprep.subr.bf16.mxu1 %v3119_v19 }
 0x6a3   :  { %2527 = vmatpush1.bf16.msra.mxu0 %v3123_v24  ;;  %2559 = vmatpush1.bf16.msra.mxu1 %v3127_v29 }
 0x6a4   :  { %2529 = vmatprep.subr.bf16.mxu0 %v3131_v33  ;;  %2561 = vmatprep.subr.bf16.mxu1 %v3135_v37  ;;  %v1816_v33 = vld [vmem:[#allocation8] sm:$0xff]  ;;  %v1817_v37 = vld [vmem:[#allocation8 + $0x8] sm:$0xff] }
 0x6a7   :  { %2531 = vmatpush1.bf16.msra.mxu0 %v3139_v40  ;;  %2563 = vmatpush1.bf16.msra.mxu1 %v3143_v42  ;;  %v2565_v40 = vpack.c.bf16 %v1817_v37, %v1816_v33  ;;  %v2919_v42 = vmov 0.0|0.0  }
 0x6a8   :  { %2564 = vmatprep.subr.bf16.mxu0 %v2919_v42 }
 0x75d   :  { %v1542_v62 = vpop.f32.mrb[12].mxu0  ;;  %v1613_v2 = vpop.f32.mrb[12].mxu1 }
 0x75e   :  { %v2600_v5 = vadd.f32 %v1542_v62, %v3195_v50  ;;  %v1544_v8 = vpop.f32.mrb[13].mxu0  ;;  %v1615_v12 = vpop.f32.mrb[13].mxu1  ;;  %v2616_v31 = vadd.f32 %v1613_v2, %v3204_v16 }
 0x75f   :  { %v2601_v15 = vadd.f32 %v1544_v8, %v3197_v52  ;;  %v2617_v25 = vadd.f32 %v1615_v12, %v3201_v9 }
 0x760   :  { %v1961_v18 = vmul.f32 -1.442695, %v2600_v5 }
 0x761   :  { %v1962_v21 = vmul.f32 -1.442695, %v2601_v15  ;;  %v1963_v28 = vmul.f32 -1.442695, %v2617_v25 }
 0x762   :  { %2760 = vpow2.f32 %v1961_v18 }
 0x763   :  { %2762 = vpow2.f32 %v1962_v21 }
 0x764   :  { %2764 = vpow2.f32 %v1963_v28 }
 0x765   :  { %2766 = vtanh.f32 %v2616_v31 }
 0x76c   :  { %v2761_v34 = vpop.eup %2760 }
 0x76d   :  { %v2763_v38 = vpop.eup %2762  ;;  %v1625_v41 = vadd.f32 1.0, %v2761_v34 }
 0x76e   :  { %v1631_v44 = vadd.f32 1.0, %v2763_v38  ;;  %v2765_v47 = vpop.eup %2764 }
 0x76f   :  { %2768 = vrcp.f32 %v1625_v41  ;;  %v2767_v51 = vpop.eup %2766  ;;  %v1638_v6 = vadd.f32 1.0, %v2765_v47  ;;  %v1967_v41 = vld [vmem:[%s3486_s5] ss:$0 sm:$0xff] }
 0x770   :  { %2770 = vrcp.f32 %v1631_v44 }
 0x771   :  { %2772 = vrcp.f32 %v1638_v6 }
 0x779   :  { %v2769_v55 = vpop.eup %2768 }
 0x77a   :  { %v2771_v59 = vpop.eup %2770  ;;  %v1642_v63 = vmul.f32 %v2769_v55, %v2767_v51 }
 0x77b   :  { %v1641_v10 = vmul.f32 %v2771_v59, %v3417_v30  ;;  %v2773_v19 = vpop.eup %2772 }
 0x77d   :  { %v3457_v14 = vadd.f32 %v1642_v63, %v1641_v10 }
 0x77f   :  { %2774 = vtanh.f32 %v3457_v14 }
 0x789   :  { %v2775_v24 = vpop.eup %2774 }
 0x78a   :  { %v1645_v29 = vmul.f32 %v2775_v24, %v2773_v19 }
 0x78c   :  { %1711 = vmatmul.mubr.f32.vlgmr.msra.gmra.mrb[14].mxu0 %v1645_v29  ;;  %1782 = vmatmul.mubr.f32.vlgmr.msra.gmra.mrb[14].mxu1 %v1645_v29 }
 0x78d   :  { %2566 = vmatpush3.bf16.msra.mxu0 %v2565_v40  ;;  %2017 = vmatprep.mubr.msk.f32.mxu0 %vm2920_vm1, %v2918_v0 }
 0x78e   :  { %2567 = vmatprep.subr.bf16.mxu0 %v2919_v42 }
 0x791   :  { %2569 = vmatpush3.bf16.msra.mxu0 %v2568_v54 }
 0x792   :  { %2570 = vmatprep.subr.bf16.mxu0 %v2919_v42 }
 0x795   :  { %2572 = vmatpush3.bf16.msra.mxu0 %v2571_v45 }
 0x796   :  { %2573 = vmatprep.subr.bf16.mxu0 %v2919_v42 }
 0x799   :  { %2575 = vmatpush3.bf16.msra.mxu0 %v2574_v58 }
 0x79a   :  { %2576 = vmatprep.subr.bf16.mxu0 %v2919_v42 }
 0x79d   :  { %2578 = vmatpush3.bf16.msra.mxu0 %v2577_v1 }
 0x79e   :  { %2579 = vmatprep.subr.bf16.mxu0 %v2919_v42 }
 0x7a1   :  { %2581 = vmatpush3.bf16.msra.mxu0 %v2580_v7 }
 0x7a2   :  { %2582 = vmatprep.subr.bf16.mxu0 %v2919_v42 }
 0x7a5   :  { %2584 = vmatpush3.bf16.msra.mxu0 %v2583_v11 }
 0x7a6   :  { %2585 = vmatprep.subr.bf16.mxu0 %v2919_v42 }
 0x7a9   :  { %2587 = vmatpush3.bf16.msra.mxu0 %v2586_v20 }
 0x85f   :  { %v1712_v22 = vpop.f32.mrb[14].mxu0  ;;  %v1783_v23 = vpop.f32.mrb[14].mxu1 }
 0x860   :  { %v2602_v26 = vadd.f32 %v1712_v22, %v3195_v50  ;;  %v1714_v27 = vpop.f32.mrb[15].mxu0  ;;  %v1785_v30 = vpop.f32.mrb[15].mxu1  ;;  %v2618_v2 = vadd.f32 %v1783_v23, %v3204_v16 }
 0x861   :  { %v2603_v32 = vadd.f32 %v1714_v27, %v3197_v52  ;;  %v2619_v0 = vadd.f32 %v1785_v30, %v3201_v9 }
 0x862   :  { %v1964_v35 = vmul.f32 -1.442695, %v2602_v26 }
 0x863   :  { %v1965_v48 = vmul.f32 -1.442695, %v2603_v32  ;;  %v1966_v62 = vmul.f32 -1.442695, %v2619_v0 }
 0x864   :  { %2776 = vpow2.f32 %v1964_v35 }
 0x865   :  { %2778 = vpow2.f32 %v1965_v48 }
 0x866   :  { %2780 = vpow2.f32 %v1966_v62 }
 0x867   :  { %2782 = vtanh.f32 %v2618_v2 }
 0x86e   :  { %v2777_v5 = vpop.eup %2776 }
 0x86f   :  { %v2779_v8 = vpop.eup %2778  ;;  %v1795_v12 = vadd.f32 1.0, %v2777_v5 }
 0x870   :  { %v1801_v15 = vadd.f32 1.0, %v2779_v8  ;;  %v2781_v50 = vpop.eup %2780 }
 0x871   :  { %2784 = vrcp.f32 %v1795_v12  ;;  %v2783_v18 = vpop.eup %2782  ;;  %v1808_v28 = vadd.f32 1.0, %v2781_v50 }
 0x872   :  { %2786 = vrcp.f32 %v1801_v15 }
 0x873   :  { %2788 = vrcp.f32 %v1808_v28 }
 0x87b   :  { %v2785_v52 = vpop.eup %2784 }
 0x87c   :  { %v2787_v21 = vpop.eup %2786  ;;  %v1812_v25 = vmul.f32 %v2785_v52, %v2783_v18 }
 0x87d   :  { %v1811_v31 = vmul.f32 %v2787_v21, %v3457_v14  ;;  %v2789_v16 = vpop.eup %2788 }
 0x87f   :  { %v1813_v9 = vadd.f32 %v1812_v25, %v1811_v31 }
 0x881   :  { %2790 = vtanh.f32 %v1813_v9 }
 0x88b   :  { %v2791_v34 = vpop.eup %2790 }
 0x88c   :  { %v1815_v38 = vmul.f32 %v2791_v34, %v2789_v16 }
 0x88e   :  { %2018 = vmatmul.mubr.f32.vlgmr.msra.gmra.mrb[16].mxu0 %v1815_v38 }
 0x961   :  { %v1905_v44 = vpop.f32.mrb[16].mxu0 }
 0x962   :  { %v1906_v47 = vadd.f32 %v1967_v41, %v1905_v44  ;;  %v2019_v51 = vpop.f32.mrb[17].mxu0 }
 0x964   :  { %1909 = vst [vmem:[#allocation10] sm:$0xff] %v1906_v47 }
 0x965   :  { %2891 = shalt.err (!%p2888_p8)
}
 0x966   :  { %s2892_s28 = scalar_lea.hbm %s3487_s6, 128 }
 0x967   :  { %p2893_p9 = scmp.ne.s32.totalorder %s3487_s6, %s2892_s28  ;;  %p2896_p10 = scmp.lt.u32.totalorder %s2892_s28, %s3487_s6 }
 0x969   :  { %p2898_p11 = pnand %p2896_p10, %p2893_p9 }
 0x96b   :  { %2901 = shalt.err (!%p2898_p11)
}
 0x96c   :  { %1919 = dma.vmem_to_hbm [thread:$0]  %s1917_s24, 128, %s3487_s6, [#allocation4]  }
 0x96d   :  { %2908 = dma.done.wait [#allocation4], 128  }
 0x96e   :  { %2909 = vsyncadd [#allocation4], 4294967168 }
 0x96f   :  { %1923 = vsyncpa [#allocation3], 1 }
 0x970   :  { %1924 = vsyncpa [#allocation6], 1 }
 0x971   :  { %1925 = vsyncpa [#allocation9], 1 }
 0x972   :  { %1926 = vsyncpa [#allocation4], 1 }

</bundles_post_ra>
